<compile_context>
chip_gen: v7x
topology: tpu7x:2x2x1
jax: 0.10.0
libtpu: 0.0.40
codegen_flags: <defaults>
</compile_context>

<pallas_src>
import math

import jax
import jax.numpy as jnp
from jax import lax
from jax.experimental import pallas as pl

# ---- synthetic config (mirrors cfg.model.* at small sizes) -------------------
EMB_DIM = 28                       # associationSpace_dim
ACT_DIM = 4                        # transformer.activity_embedding_dim
D_MODEL = EMB_DIM + ACT_DIM        # 32
NUM_HEADS = 2                      # transformer.number_heads
HEAD_DIM = D_MODEL // NUM_HEADS    # 16
DIM_FF = 64                        # transformer.dim_forward
NUM_LAYERS = 2                     # transformer.num_layers
SCALE = 1.0 / math.sqrt(HEAD_DIM)
LN_EPS = 1e-5
NEG_INF = -1e9


def _layer_norm(x, gamma, beta):
    # PyTorch LayerNorm: biased variance over the last axis.
    mean = jnp.mean(x, axis=-1, keepdims=True)
    var = jnp.mean((x - mean) ** 2, axis=-1, keepdims=True)
    return (x - mean) * lax.rsqrt(var + LN_EPS) * gamma + beta


# ------------------------------- kernel ---------------------------------------
def transformer_kernel(x0_ref, bias_ref, wqkv_ref, bqkv_ref, wo_ref,
                       w1_ref, b1_ref, w2_ref, vd_ref, out_ref):
    """Whole module in one grid-less kernel invocation.

    x0_ref   : [BL, D_MODEL] pre-assembled slab (features + activity code)
    bias_ref : [BL, BL] f32 block-diagonal + key-padding additive bias
    wqkv_ref : [NL, D, 3D]  fused QKV projection (x @ W gives [q|k|v])
    bqkv_ref : [NL, 1, 3D]
    wo_ref   : [NL, D, D]   output projection (pre-transposed to [in, out])
    w1_ref   : [NL, D, FF]  b1_ref: [NL, 1, FF]   w2_ref: [NL, FF, D]
    vd_ref   : [NL, 6, D]   stacked small vectors: (bo, b2, g1, be1, g2, be2)
    out_ref  : [BL, D_MODEL] output slab = x0 + transformer(x0)
    """
    x0 = x0_ref[...]                                    # [BL, D]
    bias = bias_ref[...]                                # [BL, BL]
    D, H, Dh = D_MODEL, NUM_HEADS, HEAD_DIM

    x = x0
    for l in range(NUM_LAYERS):                         # NUM_LAYERS is small & static
        vd = vd_ref[l]                                  # [6, D]: bo,b2,g1,be1,g2,be2

        # ---- fused QKV projection: one 96-lane matmul ------------------------
        qkv = jnp.dot(x, wqkv_ref[l],
                      preferred_element_type=jnp.float32) + bqkv_ref[l]  # [BL, 3D]

        # ---- per-head attention (only QK^T and P@V stay per-head) ------------
        ctx_heads = []
        for h in range(H):
            qh = qkv[:, h * Dh:(h + 1) * Dh]                       # [BL, Dh]
            kh = qkv[:, D + h * Dh:D + (h + 1) * Dh]               # [BL, Dh]
            vh = qkv[:, 2 * D + h * Dh:2 * D + (h + 1) * Dh]       # [BL, Dh]
            s = lax.dot_general(qh, kh, (((1,), (1,)), ((), ())),
                                preferred_element_type=jnp.float32)
            s = s * SCALE + bias                                   # [BL, BL]
            s = s - jnp.max(s, axis=-1, keepdims=True)
            p = jnp.exp(s)
            p = p * pl.reciprocal(jnp.sum(p, axis=-1, keepdims=True),
                                  approx=True)
            ctx_heads.append(jnp.dot(p, vh,
                                     preferred_element_type=jnp.float32))
        ctx = jnp.concatenate(ctx_heads, axis=-1)                  # [BL, D]

        # ---- fused output projection: one 32-lane matmul ----------------------
        attn = jnp.dot(ctx, wo_ref[l],
                       preferred_element_type=jnp.float32) + vd[0:1, :]
        x = _layer_norm(x + attn, vd[2:3, :], vd[3:4, :])

        # ---- feed-forward (relu) ----------------------------------------------
        hid = jnp.maximum(
            jnp.dot(x, w1_ref[l], preferred_element_type=jnp.float32) + b1_ref[l],
            0.0)
        ff = jnp.dot(hid, w2_ref[l],
                     preferred_element_type=jnp.float32) + vd[1:2, :]
        x = _layer_norm(x + ff, vd[4:5, :], vd[5:6, :])

    # ---- whole-module residual; single dense slab store -----------------------
    out_ref[...] = x0 + x


# ---------------------------- parameter creation ------------------------------
def init_params(key):
    """Synthetic transformer weights in standard PyTorch layout:
    in_w [NL,3D,D] (q,k,v stacked on rows), linear weights as [out,in]
    (reference applies x @ W.T + b, matching nn.Linear)."""
    ks = jax.random.split(key, 12)
    s = 0.05
    return {
        "in_w":  s * jax.random.normal(ks[0], (NUM_LAYERS, 3 * D_MODEL, D_MODEL), jnp.float32),
        "in_b":  s * jax.random.normal(ks[1], (NUM_LAYERS, 3 * D_MODEL), jnp.float32),
        "out_w": s * jax.random.normal(ks[2], (NUM_LAYERS, D_MODEL, D_MODEL), jnp.float32),
        "out_b": s * jax.random.normal(ks[3], (NUM_LAYERS, D_MODEL), jnp.float32),
        "ff1_w": s * jax.random.normal(ks[4], (NUM_LAYERS, DIM_FF, D_MODEL), jnp.float32),
        "ff1_b": s * jax.random.normal(ks[5], (NUM_LAYERS, DIM_FF), jnp.float32),
        "ff2_w": s * jax.random.normal(ks[6], (NUM_LAYERS, D_MODEL, DIM_FF), jnp.float32),
        "ff2_b": s * jax.random.normal(ks[7], (NUM_LAYERS, D_MODEL), jnp.float32),
        "ln1_g": 1.0 + s * jax.random.normal(ks[8], (NUM_LAYERS, D_MODEL), jnp.float32),
        "ln1_b": s * jax.random.normal(ks[9], (NUM_LAYERS, D_MODEL), jnp.float32),
        "ln2_g": 1.0 + s * jax.random.normal(ks[10], (NUM_LAYERS, D_MODEL), jnp.float32),
        "ln2_b": s * jax.random.normal(ks[11], (NUM_LAYERS, D_MODEL), jnp.float32),
    }


def repack_params(p):
    """One-time (model-load) repack of PyTorch-layout weights into kernel layout.
    Called OUTSIDE the jitted forward path."""
    NL = NUM_LAYERS
    return {
        "w_qkv": jnp.transpose(p["in_w"], (0, 2, 1)),              # [NL, D, 3D]
        "b_qkv": p["in_b"].reshape(NL, 1, 3 * D_MODEL),            # [NL, 1, 3D]
        "w_o":   jnp.transpose(p["out_w"], (0, 2, 1)),             # [NL, D, D]
        "w1":    jnp.transpose(p["ff1_w"], (0, 2, 1)),             # [NL, D, FF]
        "b1":    p["ff1_b"].reshape(NL, 1, DIM_FF),                # [NL, 1, FF]
        "w2":    jnp.transpose(p["ff2_w"], (0, 2, 1)),             # [NL, FF, D]
        # stacked small per-layer vectors: (bo, b2, g1, be1, g2, be2)
        "vecs_d": jnp.stack([p["out_b"], p["ff2_b"],
                             p["ln1_g"], p["ln1_b"],
                             p["ln2_g"], p["ln2_b"]], axis=1),     # [NL, 6, D]
    }


# ------------------------------- wrapper --------------------------------------
@jax.jit
def cross_attention_forward(query, actives, inactives,
                            actives_mask, inactives_mask, kparams):
    """kparams must already be in kernel layout (see repack_params)."""
    B, _, E = query.shape
    NA, NI = actives.shape[1], inactives.shape[1]
    L = 1 + NA + NI
    BL = B * L

    # ---- assemble s = concat(query+0, actives+1, inactives-1) as [BL, D] -----
    q = jnp.concatenate([query, jnp.zeros((B, 1, ACT_DIM), jnp.float32)], axis=2)
    a = jnp.concatenate([actives, jnp.ones((B, NA, ACT_DIM), jnp.float32)], axis=2)
    i = jnp.concatenate([inactives,
                         jnp.full((B, NI, ACT_DIM), -1.0, jnp.float32)], axis=2)
    x0 = jnp.concatenate([q, a, i], axis=1).reshape(BL, D_MODEL)

    # ---- block-diagonal + key-padding additive bias (int32 batch-id compare) --
    pad = jnp.concatenate([jnp.zeros((B, 1), jnp.bool_),
                           actives_mask.astype(jnp.bool_),
                           inactives_mask.astype(jnp.bool_)], axis=1).reshape(BL)
    batch_ids = jnp.repeat(jnp.arange(B, dtype=jnp.int32), L)          # [BL]
    attend = (batch_ids[:, None] == batch_ids[None, :]) & (~pad)[None, :]
    bias = jnp.where(attend, 0.0, NEG_INF).astype(jnp.float32)         # [BL, BL]

    inputs = [x0, bias,
              kparams["w_qkv"], kparams["b_qkv"], kparams["w_o"],
              kparams["w1"], kparams["b1"], kparams["w2"], kparams["vecs_d"]]

    flops = NUM_LAYERS * (2 * BL * D_MODEL * 4 * D_MODEL       # qkv + out proj
                          + 4 * BL * BL * D_MODEL              # QK^T + P@V
                          + 4 * BL * D_MODEL * DIM_FF)         # FFN
    transcendentals = NUM_LAYERS * (NUM_HEADS * BL * BL + 4 * BL)
    bytes_accessed = 4 * (sum(int(arr.size) for arr in inputs) + BL * D_MODEL)

    slab = pl.pallas_call(
        transformer_kernel,
        out_shape=jax.ShapeDtypeStruct((BL, D_MODEL), jnp.float32),
        cost_estimate=pl.CostEstimate(flops=flops,
                                      transcendentals=transcendentals,
                                      bytes_accessed=bytes_accessed),
    )(*inputs)

    # ---- split / truncate to the first E features in XLA (cheap slices) ------
    s_up = slab.reshape(B, L, D_MODEL)
    return (s_up[:, 0:1, :E],
            s_up[:, 1:1 + NA, :E],
            s_up[:, 1 + NA:, :E])


# --------------------------- pure-JAX reference --------------------------------
def ref_forward(query, actives, inactives, actives_mask, inactives_mask, params):
    B, NA, NI = query.shape[0], actives.shape[1], inactives.shape[1]
    q = jnp.concatenate([query, jnp.zeros((B, 1, ACT_DIM), query.dtype)], axis=2)
    a = jnp.concatenate([actives, jnp.ones((B, NA, ACT_DIM), actives.dtype)], axis=2)
    i = jnp.concatenate([inactives,
                         -jnp.ones((B, NI, ACT_DIM), inactives.dtype)], axis=2)
    s = jnp.concatenate([q, a, i], axis=1)                               # [B, L, D]
    pad = jnp.concatenate([jnp.zeros((B, 1), jnp.bool_),
                           actives_mask, inactives_mask], axis=1)        # [B, L]
    L = s.shape[1]
    bias = jnp.where(pad, NEG_INF, 0.0)[:, None, None, :]                # [B,1,1,L]

    x0, x = s, s
    for l in range(NUM_LAYERS):
        qkv = jnp.einsum("bld,ed->ble", x, params["in_w"][l]) + params["in_b"][l]
        qh, kh, vh = (t.reshape(B, L, NUM_HEADS, HEAD_DIM).transpose(0, 2, 1, 3)
                      for t in (qkv[..., :D_MODEL],
                                qkv[..., D_MODEL:2 * D_MODEL],
                                qkv[..., 2 * D_MODEL:]))
        sc = jnp.einsum("bhld,bhmd->bhlm", qh, kh) * SCALE + bias
        p = jax.nn.softmax(sc, axis=-1)
        ctx = jnp.einsum("bhlm,bhmd->bhld", p, vh)
        ctx = ctx.transpose(0, 2, 1, 3).reshape(B, L, D_MODEL)
        attn = jnp.einsum("bld,ed->ble", ctx, params["out_w"][l]) + params["out_b"][l]
        x = _layer_norm(x + attn, params["ln1_g"][l], params["ln1_b"][l])
        h = jax.nn.relu(jnp.einsum("bld,fd->blf", x, params["ff1_w"][l])
                        + params["ff1_b"][l])
        ff = jnp.einsum("blf,df->bld", h, params["ff2_w"][l]) + params["ff2_b"][l]
        x = _layer_norm(x + ff, params["ln2_g"][l], params["ln2_b"][l])
    s_up = x0 + x
    return (s_up[:, 0:1, :EMB_DIM],
            s_up[:, 1:1 + NA, :EMB_DIM],
            s_up[:, 1 + NA:, :EMB_DIM])


# --------------------------------- main ----------------------------------------
if __name__ == "__main__":
    B, NA, NI = 2, 3, 4
    key = jax.random.PRNGKey(0)
    k_q, k_a, k_i, k_p = jax.random.split(key, 4)

    query = jax.random.normal(k_q, (B, 1, EMB_DIM), jnp.float32)
    actives = jax.random.normal(k_a, (B, NA, EMB_DIM), jnp.float32)
    inactives = jax.random.normal(k_i, (B, NI, EMB_DIM), jnp.float32)
    actives_mask = jnp.array([[False, False, True],
                              [False, False, False]])
    inactives_mask = jnp.array([[False, True, True, True],
                                [False, False, True, True]])

    params = init_params(k_p)
    kparams = jax.tree_util.tree_map(jax.block_until_ready,
                                     repack_params(params))   # once, at model load

    out = cross_attention_forward(query, actives, inactives,
                                  actives_mask, inactives_mask, kparams)
    out = jax.block_until_ready(out)

    ref = ref_forward(query, actives, inactives,
                      actives_mask, inactives_mask, params)
    for o, r in zip(out, ref):
        assert o.shape == r.shape, (o.shape, r.shape)
        assert jnp.allclose(o, r, rtol=1e-3, atol=1e-3), float(jnp.max(jnp.abs(o - r)))

    print("KERNEL_OK")
</pallas_src>

<mosaic_0001>
module attributes {stable_mosaic.version = 11 : i64} {
  func.func @transformer_kernel(%arg0: memref<16x32xf32, #tpu.memory_space<vmem>>, %arg1: memref<16x16xf32, #tpu.memory_space<vmem>>, %arg2: memref<2x32x96xf32, #tpu.memory_space<vmem>>, %arg3: memref<2x1x96xf32, #tpu.memory_space<vmem>>, %arg4: memref<2x32x32xf32, #tpu.memory_space<vmem>>, %arg5: memref<2x32x64xf32, #tpu.memory_space<vmem>>, %arg6: memref<2x1x64xf32, #tpu.memory_space<vmem>>, %arg7: memref<2x64x32xf32, #tpu.memory_space<vmem>>, %arg8: memref<2x6x32xf32, #tpu.memory_space<vmem>>, %arg9: memref<16x32xf32, #tpu.memory_space<vmem>>) attributes {dimension_semantics = [], scalar_prefetch = 0 : i64, scratch_operands = 0 : i64, tpu.core_type = #tpu.core_type<tc>} {
    %c0 = arith.constant 0 : index
    %c0_0 = arith.constant 0 : index
    %0 = vector.load %arg0[%c0, %c0_0] : memref<16x32xf32, #tpu.memory_space<vmem>>, vector<16x32xf32>
    %c0_1 = arith.constant 0 : index
    %c0_2 = arith.constant 0 : index
    %1 = vector.load %arg1[%c0_1, %c0_2] : memref<16x16xf32, #tpu.memory_space<vmem>>, vector<16x16xf32>
    %c0_3 = arith.constant 0 : index
    %c0_4 = arith.constant 0 : index
    %c0_5 = arith.constant 0 : index
    %2 = vector.load %arg8[%c0_3, %c0_4, %c0_5] : memref<2x6x32xf32, #tpu.memory_space<vmem>>, vector<1x6x32xf32>
    %3 = vector.shape_cast %2 : vector<1x6x32xf32> to vector<6x32xf32>
    %c0_6 = arith.constant 0 : index
    %c0_7 = arith.constant 0 : index
    %c0_8 = arith.constant 0 : index
    %4 = vector.load %arg2[%c0_6, %c0_7, %c0_8] : memref<2x32x96xf32, #tpu.memory_space<vmem>>, vector<1x32x96xf32>
    %5 = vector.shape_cast %4 : vector<1x32x96xf32> to vector<32x96xf32>
    %cst = arith.constant dense<0.000000e+00> : vector<16x96xf32>
    %6 = tpu.matmul %0, %5, %cst {dimension_numbers = #tpu.dot_dimension_numbers<[1], [0], [0], [1], [0, 0, 1, 1], [], []>} : vector<16x32xf32>, vector<32x96xf32>, vector<16x96xf32> -> vector<16x96xf32>
    %c0_9 = arith.constant 0 : index
    %c0_10 = arith.constant 0 : index
    %c0_11 = arith.constant 0 : index
    %7 = vector.load %arg3[%c0_9, %c0_10, %c0_11] : memref<2x1x96xf32, #tpu.memory_space<vmem>>, vector<1x1x96xf32>
    %8 = vector.shape_cast %7 : vector<1x1x96xf32> to vector<1x96xf32>
    %9 = vector.broadcast %8 : vector<1x96xf32> to vector<16x96xf32>
    %10 = arith.addf %6, %9 : vector<16x96xf32>
    %11 = vector.extract_strided_slice %10 {offsets = [0, 0], sizes = [16, 16], strides = [1, 1]} : vector<16x96xf32> to vector<16x16xf32>
    %12 = vector.extract_strided_slice %10 {offsets = [0, 32], sizes = [16, 16], strides = [1, 1]} : vector<16x96xf32> to vector<16x16xf32>
    %13 = vector.extract_strided_slice %10 {offsets = [0, 64], sizes = [16, 16], strides = [1, 1]} : vector<16x96xf32> to vector<16x16xf32>
    %cst_12 = arith.constant dense<0.000000e+00> : vector<16x16xf32>
    %14 = tpu.matmul %11, %12, %cst_12 {dimension_numbers = #tpu.dot_dimension_numbers<[1], [1], [0], [0], [0, 0, 1, 0], [], []>} : vector<16x16xf32>, vector<16x16xf32>, vector<16x16xf32> -> vector<16x16xf32>
    %cst_13 = arith.constant 2.500000e-01 : f32
    %15 = vector.broadcast %cst_13 : f32 to vector<16x16xf32>
    %16 = arith.mulf %14, %15 : vector<16x16xf32>
    %17 = arith.addf %16, %1 : vector<16x16xf32>
    %cst_14 = arith.constant dense<0xFF800000> : vector<16xf32>
    %18 = vector.multi_reduction <maximumf>, %17, %cst_14 [1] : vector<16x16xf32> to vector<16xf32>
    %19 = vector.shape_cast %18 : vector<16xf32> to vector<16x1xf32>
    %20 = vector.broadcast %19 : vector<16x1xf32> to vector<16x16xf32>
    %21 = arith.subf %17, %20 : vector<16x16xf32>
    %22 = math.exp %21 : vector<16x16xf32>
    %cst_15 = arith.constant dense<0.000000e+00> : vector<16xf32>
    %23 = vector.multi_reduction <add>, %22, %cst_15 [1] : vector<16x16xf32> to vector<16xf32>
    %24 = vector.shape_cast %23 : vector<16xf32> to vector<16x1xf32>
    %25 = tpu.reciprocal %24 {approx = true} : vector<16x1xf32> -> vector<16x1xf32>
    %26 = vector.broadcast %25 : vector<16x1xf32> to vector<16x16xf32>
    %27 = arith.mulf %22, %26 : vector<16x16xf32>
    %cst_16 = arith.constant dense<0.000000e+00> : vector<16x16xf32>
    %28 = tpu.matmul %27, %13, %cst_16 {dimension_numbers = #tpu.dot_dimension_numbers<[1], [0], [0], [1], [0, 0, 1, 1], [], []>} : vector<16x16xf32>, vector<16x16xf32>, vector<16x16xf32> -> vector<16x16xf32>
    %29 = vector.extract_strided_slice %10 {offsets = [0, 16], sizes = [16, 16], strides = [1, 1]} : vector<16x96xf32> to vector<16x16xf32>
    %30 = vector.extract_strided_slice %10 {offsets = [0, 48], sizes = [16, 16], strides = [1, 1]} : vector<16x96xf32> to vector<16x16xf32>
    %31 = vector.extract_strided_slice %10 {offsets = [0, 80], sizes = [16, 16], strides = [1, 1]} : vector<16x96xf32> to vector<16x16xf32>
    %cst_17 = arith.constant dense<0.000000e+00> : vector<16x16xf32>
    %32 = tpu.matmul %29, %30, %cst_17 {dimension_numbers = #tpu.dot_dimension_numbers<[1], [1], [0], [0], [0, 0, 1, 0], [], []>} : vector<16x16xf32>, vector<16x16xf32>, vector<16x16xf32> -> vector<16x16xf32>
    %cst_18 = arith.constant 2.500000e-01 : f32
    %33 = vector.broadcast %cst_18 : f32 to vector<16x16xf32>
    %34 = arith.mulf %32, %33 : vector<16x16xf32>
    %35 = arith.addf %34, %1 : vector<16x16xf32>
    %cst_19 = arith.constant dense<0xFF800000> : vector<16xf32>
    %36 = vector.multi_reduction <maximumf>, %35, %cst_19 [1] : vector<16x16xf32> to vector<16xf32>
    %37 = vector.shape_cast %36 : vector<16xf32> to vector<16x1xf32>
    %38 = vector.broadcast %37 : vector<16x1xf32> to vector<16x16xf32>
    %39 = arith.subf %35, %38 : vector<16x16xf32>
    %40 = math.exp %39 : vector<16x16xf32>
    %cst_20 = arith.constant dense<0.000000e+00> : vector<16xf32>
    %41 = vector.multi_reduction <add>, %40, %cst_20 [1] : vector<16x16xf32> to vector<16xf32>
    %42 = vector.shape_cast %41 : vector<16xf32> to vector<16x1xf32>
    %43 = tpu.reciprocal %42 {approx = true} : vector<16x1xf32> -> vector<16x1xf32>
    %44 = vector.broadcast %43 : vector<16x1xf32> to vector<16x16xf32>
    %45 = arith.mulf %40, %44 : vector<16x16xf32>
    %cst_21 = arith.constant dense<0.000000e+00> : vector<16x16xf32>
    %46 = tpu.matmul %45, %31, %cst_21 {dimension_numbers = #tpu.dot_dimension_numbers<[1], [0], [0], [1], [0, 0, 1, 1], [], []>} : vector<16x16xf32>, vector<16x16xf32>, vector<16x16xf32> -> vector<16x16xf32>
    %47 = tpu.concatenate %28, %46 in 1 : vector<16x16xf32>, vector<16x16xf32> -> vector<16x32xf32>
    %c0_22 = arith.constant 0 : index
    %c0_23 = arith.constant 0 : index
    %c0_24 = arith.constant 0 : index
    %48 = vector.load %arg4[%c0_22, %c0_23, %c0_24] : memref<2x32x32xf32, #tpu.memory_space<vmem>>, vector<1x32x32xf32>
    %49 = vector.shape_cast %48 : vector<1x32x32xf32> to vector<32x32xf32>
    %cst_25 = arith.constant dense<0.000000e+00> : vector<16x32xf32>
    %50 = tpu.matmul %47, %49, %cst_25 {dimension_numbers = #tpu.dot_dimension_numbers<[1], [0], [0], [1], [0, 0, 1, 1], [], []>} : vector<16x32xf32>, vector<32x32xf32>, vector<16x32xf32> -> vector<16x32xf32>
    %51 = vector.extract_strided_slice %3 {offsets = [0, 0], sizes = [1, 32], strides = [1, 1]} : vector<6x32xf32> to vector<1x32xf32>
    %52 = vector.broadcast %51 : vector<1x32xf32> to vector<16x32xf32>
    %53 = arith.addf %50, %52 : vector<16x32xf32>
    %54 = arith.addf %0, %53 : vector<16x32xf32>
    %55 = vector.extract_strided_slice %3 {offsets = [2, 0], sizes = [1, 32], strides = [1, 1]} : vector<6x32xf32> to vector<1x32xf32>
    %56 = vector.extract_strided_slice %3 {offsets = [3, 0], sizes = [1, 32], strides = [1, 1]} : vector<6x32xf32> to vector<1x32xf32>
    %cst_26 = arith.constant dense<0.000000e+00> : vector<16xf32>
    %57 = vector.multi_reduction <add>, %54, %cst_26 [1] : vector<16x32xf32> to vector<16xf32>
    %58 = vector.shape_cast %57 : vector<16xf32> to vector<16x1xf32>
    %cst_27 = arith.constant 3.200000e+01 : f32
    %59 = vector.broadcast %cst_27 : f32 to vector<16x1xf32>
    %60 = arith.divf %58, %59 : vector<16x1xf32>
    %61 = vector.broadcast %60 : vector<16x1xf32> to vector<16x32xf32>
    %62 = arith.subf %54, %61 : vector<16x32xf32>
    %63 = arith.mulf %62, %62 : vector<16x32xf32>
    %cst_28 = arith.constant dense<0.000000e+00> : vector<16xf32>
    %64 = vector.multi_reduction <add>, %63, %cst_28 [1] : vector<16x32xf32> to vector<16xf32>
    %65 = vector.shape_cast %64 : vector<16xf32> to vector<16x1xf32>
    %cst_29 = arith.constant 3.200000e+01 : f32
    %66 = vector.broadcast %cst_29 : f32 to vector<16x1xf32>
    %67 = arith.divf %65, %66 : vector<16x1xf32>
    %68 = vector.broadcast %60 : vector<16x1xf32> to vector<16x32xf32>
    %69 = arith.subf %54, %68 : vector<16x32xf32>
    %cst_30 = arith.constant 9.99999974E-6 : f32
    %70 = vector.broadcast %cst_30 : f32 to vector<16x1xf32>
    %71 = arith.addf %67, %70 : vector<16x1xf32>
    %72 = math.rsqrt %71 : vector<16x1xf32>
    %73 = vector.broadcast %72 : vector<16x1xf32> to vector<16x32xf32>
    %74 = arith.mulf %69, %73 : vector<16x32xf32>
    %75 = vector.broadcast %55 : vector<1x32xf32> to vector<16x32xf32>
    %76 = arith.mulf %74, %75 : vector<16x32xf32>
    %77 = vector.broadcast %56 : vector<1x32xf32> to vector<16x32xf32>
    %78 = arith.addf %76, %77 : vector<16x32xf32>
    %c0_31 = arith.constant 0 : index
    %c0_32 = arith.constant 0 : index
    %c0_33 = arith.constant 0 : index
    %79 = vector.load %arg5[%c0_31, %c0_32, %c0_33] : memref<2x32x64xf32, #tpu.memory_space<vmem>>, vector<1x32x64xf32>
    %80 = vector.shape_cast %79 : vector<1x32x64xf32> to vector<32x64xf32>
    %cst_34 = arith.constant dense<0.000000e+00> : vector<16x64xf32>
    %81 = tpu.matmul %78, %80, %cst_34 {dimension_numbers = #tpu.dot_dimension_numbers<[1], [0], [0], [1], [0, 0, 1, 1], [], []>} : vector<16x32xf32>, vector<32x64xf32>, vector<16x64xf32> -> vector<16x64xf32>
    %c0_35 = arith.constant 0 : index
    %c0_36 = arith.constant 0 : index
    %c0_37 = arith.constant 0 : index
    %82 = vector.load %arg6[%c0_35, %c0_36, %c0_37] : memref<2x1x64xf32, #tpu.memory_space<vmem>>, vector<1x1x64xf32>
    %83 = vector.shape_cast %82 : vector<1x1x64xf32> to vector<1x64xf32>
    %84 = vector.broadcast %83 : vector<1x64xf32> to vector<16x64xf32>
    %85 = arith.addf %81, %84 : vector<16x64xf32>
    %cst_38 = arith.constant 0.000000e+00 : f32
    %86 = vector.broadcast %cst_38 : f32 to vector<16x64xf32>
    %87 = arith.maximumf %85, %86 : vector<16x64xf32>
    %c0_39 = arith.constant 0 : index
    %c0_40 = arith.constant 0 : index
    %c0_41 = arith.constant 0 : index
    %88 = vector.load %arg7[%c0_39, %c0_40, %c0_41] : memref<2x64x32xf32, #tpu.memory_space<vmem>>, vector<1x64x32xf32>
    %89 = vector.shape_cast %88 : vector<1x64x32xf32> to vector<64x32xf32>
    %cst_42 = arith.constant dense<0.000000e+00> : vector<16x32xf32>
    %90 = tpu.matmul %87, %89, %cst_42 {dimension_numbers = #tpu.dot_dimension_numbers<[1], [0], [0], [1], [0, 0, 1, 1], [], []>} : vector<16x64xf32>, vector<64x32xf32>, vector<16x32xf32> -> vector<16x32xf32>
    %91 = vector.extract_strided_slice %3 {offsets = [1, 0], sizes = [1, 32], strides = [1, 1]} : vector<6x32xf32> to vector<1x32xf32>
    %92 = vector.broadcast %91 : vector<1x32xf32> to vector<16x32xf32>
    %93 = arith.addf %90, %92 : vector<16x32xf32>
    %94 = arith.addf %78, %93 : vector<16x32xf32>
    %95 = vector.extract_strided_slice %3 {offsets = [4, 0], sizes = [1, 32], strides = [1, 1]} : vector<6x32xf32> to vector<1x32xf32>
    %96 = vector.extract_strided_slice %3 {offsets = [5, 0], sizes = [1, 32], strides = [1, 1]} : vector<6x32xf32> to vector<1x32xf32>
    %cst_43 = arith.constant dense<0.000000e+00> : vector<16xf32>
    %97 = vector.multi_reduction <add>, %94, %cst_43 [1] : vector<16x32xf32> to vector<16xf32>
    %98 = vector.shape_cast %97 : vector<16xf32> to vector<16x1xf32>
    %cst_44 = arith.constant 3.200000e+01 : f32
    %99 = vector.broadcast %cst_44 : f32 to vector<16x1xf32>
    %100 = arith.divf %98, %99 : vector<16x1xf32>
    %101 = vector.broadcast %100 : vector<16x1xf32> to vector<16x32xf32>
    %102 = arith.subf %94, %101 : vector<16x32xf32>
    %103 = arith.mulf %102, %102 : vector<16x32xf32>
    %cst_45 = arith.constant dense<0.000000e+00> : vector<16xf32>
    %104 = vector.multi_reduction <add>, %103, %cst_45 [1] : vector<16x32xf32> to vector<16xf32>
    %105 = vector.shape_cast %104 : vector<16xf32> to vector<16x1xf32>
    %cst_46 = arith.constant 3.200000e+01 : f32
    %106 = vector.broadcast %cst_46 : f32 to vector<16x1xf32>
    %107 = arith.divf %105, %106 : vector<16x1xf32>
    %108 = vector.broadcast %100 : vector<16x1xf32> to vector<16x32xf32>
    %109 = arith.subf %94, %108 : vector<16x32xf32>
    %cst_47 = arith.constant 9.99999974E-6 : f32
    %110 = vector.broadcast %cst_47 : f32 to vector<16x1xf32>
    %111 = arith.addf %107, %110 : vector<16x1xf32>
    %112 = math.rsqrt %111 : vector<16x1xf32>
    %113 = vector.broadcast %112 : vector<16x1xf32> to vector<16x32xf32>
    %114 = arith.mulf %109, %113 : vector<16x32xf32>
    %115 = vector.broadcast %95 : vector<1x32xf32> to vector<16x32xf32>
    %116 = arith.mulf %114, %115 : vector<16x32xf32>
    %117 = vector.broadcast %96 : vector<1x32xf32> to vector<16x32xf32>
    %118 = arith.addf %116, %117 : vector<16x32xf32>
    %c1 = arith.constant 1 : index
    %c0_48 = arith.constant 0 : index
    %c0_49 = arith.constant 0 : index
    %119 = vector.load %arg8[%c1, %c0_48, %c0_49] : memref<2x6x32xf32, #tpu.memory_space<vmem>>, vector<1x6x32xf32>
    %120 = vector.shape_cast %119 : vector<1x6x32xf32> to vector<6x32xf32>
    %c1_50 = arith.constant 1 : index
    %c0_51 = arith.constant 0 : index
    %c0_52 = arith.constant 0 : index
    %121 = vector.load %arg2[%c1_50, %c0_51, %c0_52] : memref<2x32x96xf32, #tpu.memory_space<vmem>>, vector<1x32x96xf32>
    %122 = vector.shape_cast %121 : vector<1x32x96xf32> to vector<32x96xf32>
    %cst_53 = arith.constant dense<0.000000e+00> : vector<16x96xf32>
    %123 = tpu.matmul %118, %122, %cst_53 {dimension_numbers = #tpu.dot_dimension_numbers<[1], [0], [0], [1], [0, 0, 1, 1], [], []>} : vector<16x32xf32>, vector<32x96xf32>, vector<16x96xf32> -> vector<16x96xf32>
    %c1_54 = arith.constant 1 : index
    %c0_55 = arith.constant 0 : index
    %c0_56 = arith.constant 0 : index
    %124 = vector.load %arg3[%c1_54, %c0_55, %c0_56] : memref<2x1x96xf32, #tpu.memory_space<vmem>>, vector<1x1x96xf32>
    %125 = vector.shape_cast %124 : vector<1x1x96xf32> to vector<1x96xf32>
    %126 = vector.broadcast %125 : vector<1x96xf32> to vector<16x96xf32>
    %127 = arith.addf %123, %126 : vector<16x96xf32>
    %128 = vector.extract_strided_slice %127 {offsets = [0, 0], sizes = [16, 16], strides = [1, 1]} : vector<16x96xf32> to vector<16x16xf32>
    %129 = vector.extract_strided_slice %127 {offsets = [0, 32], sizes = [16, 16], strides = [1, 1]} : vector<16x96xf32> to vector<16x16xf32>
    %130 = vector.extract_strided_slice %127 {offsets = [0, 64], sizes = [16, 16], strides = [1, 1]} : vector<16x96xf32> to vector<16x16xf32>
    %cst_57 = arith.constant dense<0.000000e+00> : vector<16x16xf32>
    %131 = tpu.matmul %128, %129, %cst_57 {dimension_numbers = #tpu.dot_dimension_numbers<[1], [1], [0], [0], [0, 0, 1, 0], [], []>} : vector<16x16xf32>, vector<16x16xf32>, vector<16x16xf32> -> vector<16x16xf32>
    %cst_58 = arith.constant 2.500000e-01 : f32
    %132 = vector.broadcast %cst_58 : f32 to vector<16x16xf32>
    %133 = arith.mulf %131, %132 : vector<16x16xf32>
    %134 = arith.addf %133, %1 : vector<16x16xf32>
    %cst_59 = arith.constant dense<0xFF800000> : vector<16xf32>
    %135 = vector.multi_reduction <maximumf>, %134, %cst_59 [1] : vector<16x16xf32> to vector<16xf32>
    %136 = vector.shape_cast %135 : vector<16xf32> to vector<16x1xf32>
    %137 = vector.broadcast %136 : vector<16x1xf32> to vector<16x16xf32>
    %138 = arith.subf %134, %137 : vector<16x16xf32>
    %139 = math.exp %138 : vector<16x16xf32>
    %cst_60 = arith.constant dense<0.000000e+00> : vector<16xf32>
    %140 = vector.multi_reduction <add>, %139, %cst_60 [1] : vector<16x16xf32> to vector<16xf32>
    %141 = vector.shape_cast %140 : vector<16xf32> to vector<16x1xf32>
    %142 = tpu.reciprocal %141 {approx = true} : vector<16x1xf32> -> vector<16x1xf32>
    %143 = vector.broadcast %142 : vector<16x1xf32> to vector<16x16xf32>
    %144 = arith.mulf %139, %143 : vector<16x16xf32>
    %cst_61 = arith.constant dense<0.000000e+00> : vector<16x16xf32>
    %145 = tpu.matmul %144, %130, %cst_61 {dimension_numbers = #tpu.dot_dimension_numbers<[1], [0], [0], [1], [0, 0, 1, 1], [], []>} : vector<16x16xf32>, vector<16x16xf32>, vector<16x16xf32> -> vector<16x16xf32>
    %146 = vector.extract_strided_slice %127 {offsets = [0, 16], sizes = [16, 16], strides = [1, 1]} : vector<16x96xf32> to vector<16x16xf32>
    %147 = vector.extract_strided_slice %127 {offsets = [0, 48], sizes = [16, 16], strides = [1, 1]} : vector<16x96xf32> to vector<16x16xf32>
    %148 = vector.extract_strided_slice %127 {offsets = [0, 80], sizes = [16, 16], strides = [1, 1]} : vector<16x96xf32> to vector<16x16xf32>
    %cst_62 = arith.constant dense<0.000000e+00> : vector<16x16xf32>
    %149 = tpu.matmul %146, %147, %cst_62 {dimension_numbers = #tpu.dot_dimension_numbers<[1], [1], [0], [0], [0, 0, 1, 0], [], []>} : vector<16x16xf32>, vector<16x16xf32>, vector<16x16xf32> -> vector<16x16xf32>
    %cst_63 = arith.constant 2.500000e-01 : f32
    %150 = vector.broadcast %cst_63 : f32 to vector<16x16xf32>
    %151 = arith.mulf %149, %150 : vector<16x16xf32>
    %152 = arith.addf %151, %1 : vector<16x16xf32>
    %cst_64 = arith.constant dense<0xFF800000> : vector<16xf32>
    %153 = vector.multi_reduction <maximumf>, %152, %cst_64 [1] : vector<16x16xf32> to vector<16xf32>
    %154 = vector.shape_cast %153 : vector<16xf32> to vector<16x1xf32>
    %155 = vector.broadcast %154 : vector<16x1xf32> to vector<16x16xf32>
    %156 = arith.subf %152, %155 : vector<16x16xf32>
    %157 = math.exp %156 : vector<16x16xf32>
    %cst_65 = arith.constant dense<0.000000e+00> : vector<16xf32>
    %158 = vector.multi_reduction <add>, %157, %cst_65 [1] : vector<16x16xf32> to vector<16xf32>
    %159 = vector.shape_cast %158 : vector<16xf32> to vector<16x1xf32>
    %160 = tpu.reciprocal %159 {approx = true} : vector<16x1xf32> -> vector<16x1xf32>
    %161 = vector.broadcast %160 : vector<16x1xf32> to vector<16x16xf32>
    %162 = arith.mulf %157, %161 : vector<16x16xf32>
    %cst_66 = arith.constant dense<0.000000e+00> : vector<16x16xf32>
    %163 = tpu.matmul %162, %148, %cst_66 {dimension_numbers = #tpu.dot_dimension_numbers<[1], [0], [0], [1], [0, 0, 1, 1], [], []>} : vector<16x16xf32>, vector<16x16xf32>, vector<16x16xf32> -> vector<16x16xf32>
    %164 = tpu.concatenate %145, %163 in 1 : vector<16x16xf32>, vector<16x16xf32> -> vector<16x32xf32>
    %c1_67 = arith.constant 1 : index
    %c0_68 = arith.constant 0 : index
    %c0_69 = arith.constant 0 : index
    %165 = vector.load %arg4[%c1_67, %c0_68, %c0_69] : memref<2x32x32xf32, #tpu.memory_space<vmem>>, vector<1x32x32xf32>
    %166 = vector.shape_cast %165 : vector<1x32x32xf32> to vector<32x32xf32>
    %cst_70 = arith.constant dense<0.000000e+00> : vector<16x32xf32>
    %167 = tpu.matmul %164, %166, %cst_70 {dimension_numbers = #tpu.dot_dimension_numbers<[1], [0], [0], [1], [0, 0, 1, 1], [], []>} : vector<16x32xf32>, vector<32x32xf32>, vector<16x32xf32> -> vector<16x32xf32>
    %168 = vector.extract_strided_slice %120 {offsets = [0, 0], sizes = [1, 32], strides = [1, 1]} : vector<6x32xf32> to vector<1x32xf32>
    %169 = vector.broadcast %168 : vector<1x32xf32> to vector<16x32xf32>
    %170 = arith.addf %167, %169 : vector<16x32xf32>
    %171 = arith.addf %118, %170 : vector<16x32xf32>
    %172 = vector.extract_strided_slice %120 {offsets = [2, 0], sizes = [1, 32], strides = [1, 1]} : vector<6x32xf32> to vector<1x32xf32>
    %173 = vector.extract_strided_slice %120 {offsets = [3, 0], sizes = [1, 32], strides = [1, 1]} : vector<6x32xf32> to vector<1x32xf32>
    %cst_71 = arith.constant dense<0.000000e+00> : vector<16xf32>
    %174 = vector.multi_reduction <add>, %171, %cst_71 [1] : vector<16x32xf32> to vector<16xf32>
    %175 = vector.shape_cast %174 : vector<16xf32> to vector<16x1xf32>
    %cst_72 = arith.constant 3.200000e+01 : f32
    %176 = vector.broadcast %cst_72 : f32 to vector<16x1xf32>
    %177 = arith.divf %175, %176 : vector<16x1xf32>
    %178 = vector.broadcast %177 : vector<16x1xf32> to vector<16x32xf32>
    %179 = arith.subf %171, %178 : vector<16x32xf32>
    %180 = arith.mulf %179, %179 : vector<16x32xf32>
    %cst_73 = arith.constant dense<0.000000e+00> : vector<16xf32>
    %181 = vector.multi_reduction <add>, %180, %cst_73 [1] : vector<16x32xf32> to vector<16xf32>
    %182 = vector.shape_cast %181 : vector<16xf32> to vector<16x1xf32>
    %cst_74 = arith.constant 3.200000e+01 : f32
    %183 = vector.broadcast %cst_74 : f32 to vector<16x1xf32>
    %184 = arith.divf %182, %183 : vector<16x1xf32>
    %185 = vector.broadcast %177 : vector<16x1xf32> to vector<16x32xf32>
    %186 = arith.subf %171, %185 : vector<16x32xf32>
    %cst_75 = arith.constant 9.99999974E-6 : f32
    %187 = vector.broadcast %cst_75 : f32 to vector<16x1xf32>
    %188 = arith.addf %184, %187 : vector<16x1xf32>
    %189 = math.rsqrt %188 : vector<16x1xf32>
    %190 = vector.broadcast %189 : vector<16x1xf32> to vector<16x32xf32>
    %191 = arith.mulf %186, %190 : vector<16x32xf32>
    %192 = vector.broadcast %172 : vector<1x32xf32> to vector<16x32xf32>
    %193 = arith.mulf %191, %192 : vector<16x32xf32>
    %194 = vector.broadcast %173 : vector<1x32xf32> to vector<16x32xf32>
    %195 = arith.addf %193, %194 : vector<16x32xf32>
    %c1_76 = arith.constant 1 : index
    %c0_77 = arith.constant 0 : index
    %c0_78 = arith.constant 0 : index
    %196 = vector.load %arg5[%c1_76, %c0_77, %c0_78] : memref<2x32x64xf32, #tpu.memory_space<vmem>>, vector<1x32x64xf32>
    %197 = vector.shape_cast %196 : vector<1x32x64xf32> to vector<32x64xf32>
    %cst_79 = arith.constant dense<0.000000e+00> : vector<16x64xf32>
    %198 = tpu.matmul %195, %197, %cst_79 {dimension_numbers = #tpu.dot_dimension_numbers<[1], [0], [0], [1], [0, 0, 1, 1], [], []>} : vector<16x32xf32>, vector<32x64xf32>, vector<16x64xf32> -> vector<16x64xf32>
    %c1_80 = arith.constant 1 : index
    %c0_81 = arith.constant 0 : index
    %c0_82 = arith.constant 0 : index
    %199 = vector.load %arg6[%c1_80, %c0_81, %c0_82] : memref<2x1x64xf32, #tpu.memory_space<vmem>>, vector<1x1x64xf32>
    %200 = vector.shape_cast %199 : vector<1x1x64xf32> to vector<1x64xf32>
    %201 = vector.broadcast %200 : vector<1x64xf32> to vector<16x64xf32>
    %202 = arith.addf %198, %201 : vector<16x64xf32>
    %cst_83 = arith.constant 0.000000e+00 : f32
    %203 = vector.broadcast %cst_83 : f32 to vector<16x64xf32>
    %204 = arith.maximumf %202, %203 : vector<16x64xf32>
    %c1_84 = arith.constant 1 : index
    %c0_85 = arith.constant 0 : index
    %c0_86 = arith.constant 0 : index
    %205 = vector.load %arg7[%c1_84, %c0_85, %c0_86] : memref<2x64x32xf32, #tpu.memory_space<vmem>>, vector<1x64x32xf32>
    %206 = vector.shape_cast %205 : vector<1x64x32xf32> to vector<64x32xf32>
    %cst_87 = arith.constant dense<0.000000e+00> : vector<16x32xf32>
    %207 = tpu.matmul %204, %206, %cst_87 {dimension_numbers = #tpu.dot_dimension_numbers<[1], [0], [0], [1], [0, 0, 1, 1], [], []>} : vector<16x64xf32>, vector<64x32xf32>, vector<16x32xf32> -> vector<16x32xf32>
    %208 = vector.extract_strided_slice %120 {offsets = [1, 0], sizes = [1, 32], strides = [1, 1]} : vector<6x32xf32> to vector<1x32xf32>
    %209 = vector.broadcast %208 : vector<1x32xf32> to vector<16x32xf32>
    %210 = arith.addf %207, %209 : vector<16x32xf32>
    %211 = arith.addf %195, %210 : vector<16x32xf32>
    %212 = vector.extract_strided_slice %120 {offsets = [4, 0], sizes = [1, 32], strides = [1, 1]} : vector<6x32xf32> to vector<1x32xf32>
    %213 = vector.extract_strided_slice %120 {offsets = [5, 0], sizes = [1, 32], strides = [1, 1]} : vector<6x32xf32> to vector<1x32xf32>
    %cst_88 = arith.constant dense<0.000000e+00> : vector<16xf32>
    %214 = vector.multi_reduction <add>, %211, %cst_88 [1] : vector<16x32xf32> to vector<16xf32>
    %215 = vector.shape_cast %214 : vector<16xf32> to vector<16x1xf32>
    %cst_89 = arith.constant 3.200000e+01 : f32
    %216 = vector.broadcast %cst_89 : f32 to vector<16x1xf32>
    %217 = arith.divf %215, %216 : vector<16x1xf32>
    %218 = vector.broadcast %217 : vector<16x1xf32> to vector<16x32xf32>
    %219 = arith.subf %211, %218 : vector<16x32xf32>
    %220 = arith.mulf %219, %219 : vector<16x32xf32>
    %cst_90 = arith.constant dense<0.000000e+00> : vector<16xf32>
    %221 = vector.multi_reduction <add>, %220, %cst_90 [1] : vector<16x32xf32> to vector<16xf32>
    %222 = vector.shape_cast %221 : vector<16xf32> to vector<16x1xf32>
    %cst_91 = arith.constant 3.200000e+01 : f32
    %223 = vector.broadcast %cst_91 : f32 to vector<16x1xf32>
    %224 = arith.divf %222, %223 : vector<16x1xf32>
    %225 = vector.broadcast %217 : vector<16x1xf32> to vector<16x32xf32>
    %226 = arith.subf %211, %225 : vector<16x32xf32>
    %cst_92 = arith.constant 9.99999974E-6 : f32
    %227 = vector.broadcast %cst_92 : f32 to vector<16x1xf32>
    %228 = arith.addf %224, %227 : vector<16x1xf32>
    %229 = math.rsqrt %228 : vector<16x1xf32>
    %230 = vector.broadcast %229 : vector<16x1xf32> to vector<16x32xf32>
    %231 = arith.mulf %226, %230 : vector<16x32xf32>
    %232 = vector.broadcast %212 : vector<1x32xf32> to vector<16x32xf32>
    %233 = arith.mulf %231, %232 : vector<16x32xf32>
    %234 = vector.broadcast %213 : vector<1x32xf32> to vector<16x32xf32>
    %235 = arith.addf %233, %234 : vector<16x32xf32>
    %236 = arith.addf %0, %235 : vector<16x32xf32>
    %c0_93 = arith.constant 0 : index
    %c0_94 = arith.constant 0 : index
    %237 = vector.load %arg9[%c0_93, %c0_94] : memref<16x32xf32, #tpu.memory_space<vmem>>, vector<16x32xf32>
    tpu.vector_store %arg9[%c0_93, %c0_94], %236 {strides = array<i32>} : memref<16x32xf32, #tpu.memory_space<vmem>>, vector<16x32xf32>,
    return
  }
}

</mosaic_0001>

<bundles_post_ra>
// kernel: eq.8
= control target key start
LH: loop header
LB: loop body
LE: loop exit
PB: predicated region body
PF: predicated region fallthrough
CT: control target
= control target key end

     0   :  { %vm7_vm0 = vcmask 64512   ;;  %vm13_vm1 = vcmask 130112   ;;  %s39_s0 = inlined_call_operand.vmem [shape: s32[2,8], index: 0, kind: input, shape index: {}]   ;;  %s40_s1 = inlined_call_operand.vmem [shape: s32[16], index: 1, kind: output, shape index: {}]  }
   0x1   :  { %v4_v0 = vld [vmem:[%s39_s0] sm:$0x3]  ;;  %s22_s0 = smov 8  }
   0x2   :  { %5 = vst [vmem:[#allocation1] sm:$0x3] %v4_v0 }
   0x9   :  { %v10_v1 = vld [vmem:[#allocation1 + $0x1] sm:$0x1]   ;;  %v6_v2 = vld [vmem:[#allocation1] sm:$0x1]  }
   0xa   :  { %11 = vrot.lane.b32.xlu0 %v10_v1, %s22_s0  ;;  %8 = vst.msk [vmem:[#allocation0] sm:$0x1] %vm7_vm0, %v6_v2  }
  0x7c   :  { %v12_v3 = vpop.permute.xlu0 %11  }
  0x7d   :  { %14 = vst.msk [vmem:[#allocation0] sm:$0x1] %vm13_vm1, %v12_v3  }
  0x84   :  { %v18_v4 = vld [vmem:[#allocation0] sm:$0x1] }
  0x85   :  { %20 = vst [vmem:[%s40_s1] sm:$0x1] %v18_v4 }

// kernel: cross_attention_forward.1
= control target key start
LH: loop header
LB: loop body
LE: loop exit
PB: predicated region body
PF: predicated region fallthrough
CT: control target
= control target key end

     0   :  { %vm48_vm0 = vcmask 261120   ;;  %vm136_vm1 = vcmask 130048   ;;  %s2316_s23 = smov 112   ;;  %s2317_s24 = smov 96   ;;  %vm783_vm3 = vcmask 523264   ;;  %s2730_s2 = inlined_call_operand.vmem [shape: f32[2,32,96], index: 2, kind: input, shape index: {}]   ;;  %s2731_s0 = inlined_call_operand.vmem [shape: f32[16,32], index: 0, kind: input, shape index: {}]   ;;  %s2732_s3 = inlined_call_operand.vmem [shape: f32[2,1,96], index: 3, kind: input, shape index: {}]   ;;  %s2733_s1 = inlined_call_operand.vmem [shape: f32[16,16], index: 1, kind: input, shape index: {}]   ;;  %s2734_s4 = inlined_call_operand.vmem [shape: f32[2,32,32], index: 4, kind: input, shape index: {}]   ;;  %s2735_s8 = inlined_call_operand.vmem [shape: f32[2,6,32], index: 8, kind: input, shape index: {}]   ;;  %s2736_s5 = inlined_call_operand.vmem [shape: f32[2,32,64], index: 5, kind: input, shape index: {}]   ;;  %s2737_s7 = inlined_call_operand.vmem [shape: f32[2,64,32], index: 7, kind: input, shape index: {}]   ;;  %s2738_s6 = inlined_call_operand.vmem [shape: f32[2,1,64], index: 6, kind: input, shape index: {}]   ;;  %s2739_s9 = inlined_call_operand.vmem [shape: f32[16,32], index: 9, kind: output, shape index: {}]  }
   0x1   :  { %v37_v0 = vld [vmem:[%s2730_s2] sm:$0xff]  ;;  %v38_v1 = vld [vmem:[%s2730_s2 + $0x8] sm:$0xff]  ;;  %v39_v2 = vld [vmem:[%s2730_s2 + $0x10] sm:$0xff]  ;;  %s2318_s25 = smov 80   ;;  %s2320_s30 = smov 48  }
   0x2   :  { %v2100_v3 = vpack.c.bf16 %v38_v1, %v37_v0  ;;  %v40_v4 = vld [vmem:[%s2730_s2 + $0x18] sm:$0xff]  ;;  %v2387_v5 = vld [vmem:[%s2731_s0] sm:$0xff]  ;;  %v2394_v7 = vld [vmem:[%s2731_s0 + $0x8] sm:$0xff]  ;;  %s2321_s18 = smov 16  }
   0x3   :  { %v2104_v6 = vpack.c.bf16 %v40_v4, %v39_v2  ;;  %1948 = vmatprep.mubr.msk.f32.mxu1 %vm48_vm0, %v2387_v5  ;;  %v1785_v8 = vld [vmem:[%s2732_s3] ss:$0 sm:$0xff]  ;;  %vm2412_vm2 = vmpackc.low %vm136_vm1, %vm136_vm1  ;;  %v2430_v26 = vld [vmem:[%s2733_s1 + $0x8] sm:$0xff] }
   0x4   :  { %2101 = vmatprep.subr.bf16.mxu1 %v2100_v3  ;;  %v2435_v29 = vld [vmem:[%s2733_s1] sm:$0xff]  ;;  %s2319_s1 = smov 64  }
   0x5   :  { %2103 = vmatpush3.bf16.msra.mxu1 %v2100_v3 }
   0x6   :  { %2105 = vmatprep.subr.bf16.mxu1 %v2104_v6 }
   0x9   :  { %2107 = vmatpush3.bf16.msra.mxu1 %v2104_v6 }
   0xc   :  { %1949 = vmatmul.mubr.msk.f32.vlgmr.msra.gmra.mrb[0].mxu1 %vm48_vm0, %v2394_v7 }
  0xdf   :  { %v1950_v9 = vpop.f32.mrb[0].mxu1 }
  0xe0   :  { %v127_v10 = vadd.f32 %v1950_v9, %v1785_v8  ;;  %v121_v11 = vpop.f32.mrb[1].mxu1 }
  0xe1   :  { %v122_v12 = vadd.f32 %v1785_v8, %v121_v11 }
  0xe3   :  { %333 = vrot.lane.b32.xlu1 %v122_v12, %s2316_s23  ;;  %1955 = vmatprep.mubr.msk.f32.mxu1 %vm136_vm1, %v122_v12  ;;  %v2403_v13 = vpack.i.bf16 %v127_v10, %v122_v12 }
  0xe5   :  { %2227 = vrot.lane.b32.xlu0 %v2403_v13, %s2317_s24 }
  0xe7   :  { %335 = vrot.lane.b32.xlu1 %v127_v10, %s2316_s23 }
  0xe9   :  { %2232 = vrot.lane.b32.xlu0 %v2403_v13, %s2318_s25 }
 0x155   :  { %v334_v23 = vpop.permute.xlu1 %333 }
 0x157   :  { %v2228_v14 = vpop.permute.xlu0 %2227 }
 0x158   :  { %v2230_v15 = vunpack.i.h.bf16 %v2228_v14  ;;  %v2229_v16 = vunpack.i.l.bf16 %v2228_v14 }
 0x159   :  { %v336_v24 = vpop.permute.xlu1 %335 }
 0x15a   :  { %v2108_v18 = vpack.c.bf16 %v2230_v15, %v2229_v16 }
 0x15b   :  { %v2233_v19 = vpop.permute.xlu0 %2232 }
 0x15c   :  { %v2235_v20 = vunpack.i.h.bf16 %v2233_v19  ;;  %v2234_v21 = vunpack.i.l.bf16 %v2233_v19  ;;  %2110 = vmatprep.subr.msk.bf16.mxu1 %vm2412_vm2, %v2108_v18 }
 0x15d   :  { %2113 = vmatpush3.bf16.xpose.msk.msra.mxu1 %vm2412_vm2, %v2108_v18 }
 0x15e   :  { %v2118_v22 = vpack.c.bf16 %v2235_v20, %v2234_v21 }
 0x160   :  { %2120 = vmatprep.subr.msk.bf16.mxu1 %vm2412_vm2, %v2118_v22 }
 0x164   :  { %1956 = vmatmul.mubr.msk.f32.vlgmr.msra.gmra.mrb[2].mxu1 %vm136_vm1, %v127_v10 }
 0x165   :  { %2123 = vmatpush3.bf16.xpose.msk.msra.mxu1 %vm2412_vm2, %v2118_v22  ;;  %1969 = vmatprep.mubr.msk.f32.mxu1 %vm136_vm1, %v334_v23  ;;  %v547_v22 = vld [vmem:[%s2734_s4] sm:$0xff]  ;;  %v548_v23 = vld [vmem:[%s2734_s4 + $0x8] sm:$0xff] }
 0x16c   :  { %1970 = vmatmul.mubr.msk.f32.vlgmr.msra.gmra.mrb[4].mxu1 %vm136_vm1, %v336_v24  ;;  %v2128_v24 = vpack.c.bf16 %v548_v23, %v547_v22 }
 0x237   :  { %v1957_v25 = vpop.f32.mrb[2].mxu1 }
 0x238   :  { %v221_v27 = vmul.f32 0.25, %v1957_v25  ;;  %v211_v28 = vpop.f32.mrb[3].mxu1  ;;  %v549_v25 = vld [vmem:[%s2734_s4 + $0x10] sm:$0xff] }
 0x239   :  { %v220_v30 = vmul.f32 0.25, %v211_v28 }
 0x23a   :  { %v223_v31 = vadd.f32 %v221_v27, %v2430_v26  ;;  %v550_v27 = vld [vmem:[%s2734_s4 + $0x18] sm:$0xff] }
 0x23b   :  { %v222_v32 = vadd.f32 %v220_v30, %v2435_v29  ;;  %v2132_v28 = vpack.c.bf16 %v550_v27, %v549_v25 }
 0x23c   :  { %v227_v33 = vsel %vm136_vm1, %v223_v31, -inf }
 0x23d   :  { %228 = vmax.xlane.f32.xlu1 %v227_v33  ;;  %v224_v34 = vsel %vm136_vm1, %v222_v32, -inf }
 0x23e   :  { %225 = vmax.xlane.f32.xlu0 %v224_v34 }
 0x23f   :  { %v1971_v35 = vpop.f32.mrb[4].mxu1 }
 0x240   :  { %v415_v36 = vpop.f32.mrb[5].mxu1  ;;  %v425_v37 = vmul.f32 0.25, %v1971_v35 }
 0x241   :  { %v424_v38 = vmul.f32 0.25, %v415_v36 }
 0x242   :  { %v427_v41 = vadd.f32 %v425_v37, %v2430_v26 }
 0x243   :  { %v426_v39 = vadd.f32 %v424_v38, %v2435_v29  ;;  %v551_v38 = vlaneseq }
 0x244   :  { %v431_v42 = vsel %vm136_vm1, %v427_v41, -inf }
 0x245   :  { %v428_v40 = vsel %vm136_vm1, %v426_v39, -inf }
 0x246   :  { %429 = vmax.xlane.f32.xlu0 %v428_v40 }
 0x24a   :  { %432 = vmax.xlane.f32.xlu0 %v431_v42 }
 0x2ca   :  { %v229_v43 = vpop.xlane.xlu1 %228 }
 0x2cb   :  { %v231_v44 = vsub.f32 %v223_v31, %v229_v43  ;;  %v226_v45 = vpop.xlane.xlu0 %225 }
 0x2cc   :  { %v230_v46 = vsub.f32 %v222_v32, %v226_v45 }
 0x2cd   :  { %v234_v47 = vmul.f32 1.442695, %v231_v44 }
 0x2ce   :  { %v232_v48 = vmul.f32 1.442695, %v230_v46 }
 0x2cf   :  { %2266 = vpow2.f32 %v234_v47 }
 0x2d0   :  { %2268 = vpow2.f32 %v232_v48 }
 0x2d3   :  { %v430_v49 = vpop.xlane.xlu0 %429 }
 0x2d4   :  { %v434_v50 = vsub.f32 %v426_v39, %v430_v49  ;;  %v2475_v39 = vshrl.u32 %v551_v38, 7 }
 0x2d6   :  { %v436_v51 = vmul.f32 1.442695, %v434_v50  ;;  %v553_v40 = vsub.s32 0, %v2475_v39 }
 0x2d7   :  { %v433_v52 = vpop.xlane.xlu0 %432 }
 0x2d8   :  { %2270 = vpow2.f32 %v436_v51  ;;  %v435_v53 = vsub.f32 %v427_v41, %v433_v52  ;;  %v2481_v41 = vld [vmem:[%s2735_s8] sm:$0x3f] }
 0x2d9   :  { %v2267_v54 = vpop.eup %2266  ;;  %v554_v42 = vrot.slane %v2481_v41, %v553_v40 }
 0x2da   :  { %v2269_v55 = vpop.eup %2268  ;;  %v438_v56 = vmul.f32 1.442695, %v435_v53  ;;  %v239_v57 = vsel %vm136_vm1, %v2267_v54, 0.0 }
 0x2db   :  { %240 = vadd.xlane.f32.xlu0 %v239_v57  ;;  %v236_v58 = vsel %vm136_vm1, %v2269_v55, 0.0 }
 0x2dc   :  { %2272 = vpow2.f32 %v438_v56  ;;  %237 = vadd.xlane.f32.xlu1 %v236_v58 }
 0x2e2   :  { %v2271_v59 = vpop.eup %2270 }
 0x2e3   :  { %v440_v60 = vsel %vm136_vm1, %v2271_v59, 0.0 }
 0x2e4   :  { %441 = vadd.xlane.f32.xlu1 %v440_v60  ;;  %v678_v60 = vld [vmem:[%s2736_s5 + $0x8] sm:$0xff] }
 0x2e6   :  { %v2273_v61 = vpop.eup %2272 }
 0x2e7   :  { %v443_v62 = vsel %vm136_vm1, %v2273_v61, 0.0 }
 0x2e8   :  { %444 = vadd.xlane.f32.xlu0 %v443_v62  ;;  %v679_v62 = vld [vmem:[%s2736_s5 + $0x10] sm:$0xff] }
 0x2f5   :  { %2237 = vrot.lane.b32.xlu1 %v2403_v13, %s2319_s1 }
 0x2fe   :  { %2242 = vrot.lane.b32.xlu0 %v2403_v13, %s2320_s30 }
 0x368   :  { %v241_v0 = vpop.xlane.xlu0 %240 }
 0x369   :  { %v238_v63 = vpop.xlane.xlu1 %237 }
 0x36a   :  { %2274 = vrcp.f32 %v238_v63  ;;  %v680_v63 = vld [vmem:[%s2736_s5 + $0x18] sm:$0xff] }
 0x36b   :  { %2276 = vrcp.f32 %v241_v0  ;;  %v2140_v0 = vpack.c.bf16 %v680_v63, %v679_v62 }
 0x371   :  { %v442_v1 = vpop.xlane.xlu1 %441 }
 0x372   :  { %2278 = vrcp.f32 %v442_v1  ;;  %v771_v1 = vld [vmem:[%s2737_s7] sm:$0xff] }
 0x374   :  { %v2275_v2 = vpop.eup %2274 }
 0x375   :  { %v2238_v3 = vpop.permute.xlu1 %2237  ;;  %v445_v4 = vpop.xlane.xlu0 %444  ;;  %v244_v6 = vmul.f32 %v2275_v2, %v2269_v55  ;;  %v772_v2 = vld [vmem:[%s2737_s7 + $0x8] sm:$0xff] }
 0x376   :  { %v2240_v8 = vunpack.i.h.bf16 %v2238_v3  ;;  %v2239_v9 = vunpack.i.l.bf16 %v2238_v3  ;;  %2280 = vrcp.f32 %v445_v4  ;;  %v2277_v11 = vpop.eup %2276  ;;  %v773_v3 = vld [vmem:[%s2737_s7 + $0x10] sm:$0xff]  ;;  %v2144_v4 = vpack.c.bf16 %v772_v2, %v771_v1  ;;  %v1809_v1 = vld [vmem:[%s2730_s2 + $0x28] sm:$0xff] }
 0x377   :  { %1962 = vmatprep.mubr.msk.f32.mxu0 %vm136_vm1, %v244_v6  ;;  %v245_v18 = vmul.f32 %v2277_v11, %v2267_v54  ;;  %v774_v6 = vld [vmem:[%s2737_s7 + $0x18] sm:$0xff] }
 0x378   :  { %v2114_v10 = vpack.c.bf16 %v2240_v8, %v2239_v9  ;;  %v2148_v8 = vpack.c.bf16 %v774_v6, %v773_v3  ;;  %v775_v9 = vld [vmem:[%s2737_s7 + $0x20] sm:$0xff]  ;;  %v1810_v3 = vld [vmem:[%s2730_s2 + $0x30] sm:$0xff] }
 0x379   :  { %v2243_v12 = vpop.permute.xlu0 %2242 }
 0x37a   :  { %v2245_v14 = vunpack.i.h.bf16 %v2243_v12  ;;  %v2244_v13 = vunpack.i.l.bf16 %v2243_v12  ;;  %2115 = vmatprep.subr.bf16.mxu0 %v2114_v10 }
 0x37b   :  { %2117 = vmatpush3.bf16.msra.mxu0 %v2114_v10  ;;  %v776_v10 = vld [vmem:[%s2737_s7 + $0x28] sm:$0xff] }
 0x37c   :  { %v2279_v15 = vpop.eup %2278  ;;  %v2124_v16 = vpack.c.bf16 %v2245_v14, %v2244_v13  ;;  %v2152_v11 = vpack.c.bf16 %v776_v10, %v775_v9 }
 0x37d   :  { %v448_v19 = vmul.f32 %v2279_v15, %v2271_v59 }
 0x37e   :  { %1963 = vmatmul.mubr.msk.f32.vlgmr.msra.gmra.mrb[0].mxu0 %vm136_vm1, %v245_v18  ;;  %2125 = vmatprep.subr.bf16.mxu0 %v2124_v16 }
 0x37f   :  { %2127 = vmatpush3.bf16.msra.mxu0 %v2124_v16  ;;  %1976 = vmatprep.mubr.msk.f32.mxu0 %vm136_vm1, %v448_v19  ;;  %v667_v19 = vsub.s32 2, %v2475_v39 }
 0x380   :  { %v2281_v20 = vpop.eup %2280  ;;  %2129 = vmatprep.subr.bf16.mxu0 %v2128_v24 }
 0x381   :  { %v449_v21 = vmul.f32 %v2281_v20, %v2273_v61  ;;  %v673_v20 = vsub.s32 3, %v2475_v39 }
 0x383   :  { %1977 = vmatmul.mubr.msk.f32.vlgmr.msra.gmra.mrb[2].mxu0 %vm136_vm1, %v449_v21  ;;  %v668_v21 = vrot.slane %v2481_v41, %v667_v19 }
 0x384   :  { %2131 = vmatpush3.bf16.msra.mxu0 %v2128_v24  ;;  %v674_v24 = vrot.slane %v2481_v41, %v673_v20 }
 0x385   :  { %2133 = vmatprep.subr.bf16.mxu0 %v2132_v28 }
 0x388   :  { %2135 = vmatpush3.bf16.msra.mxu0 %v2132_v28 }
 0x389   :  { %2145 = vmatprep.subr.bf16.mxu0 %v2144_v4 }
 0x451   :  { %v1964_v30 = vpop.f32.mrb[0].mxu0 }
 0x452   :  { %v324_v31 = vpop.f32.mrb[1].mxu0 }
 0x456   :  { %v1978_v32 = vpop.f32.mrb[2].mxu0 }
 0x457   :  { %v528_v33 = vpop.f32.mrb[3].mxu0 }
 0x458   :  { %539 = vrot.lane.b32.xlu1 %v528_v33, %s2321_s18  ;;  %v777_v33 = vld [vmem:[%s2737_s7 + $0x30] sm:$0xff] }
 0x45c   :  { %541 = vrot.lane.b32.xlu1 %v1978_v32, %s2321_s18 }
 0x4ca   :  { %v540_v34 = vpop.permute.xlu1 %539 }
 0x4cb   :  { %v545_v35 = vsel %vm136_vm1, %v324_v31, %v540_v34  ;;  %v778_v34 = vld [vmem:[%s2737_s7 + $0x38] sm:$0xff] }
 0x4cc   :  { %1987 = vmatprep.mubr.msk.f32.mxu0 %vm48_vm0, %v545_v35  ;;  %v2156_v35 = vpack.c.bf16 %v778_v34, %v777_v33 }
 0x4ce   :  { %v542_v36 = vpop.permute.xlu1 %541 }
 0x4cf   :  { %v546_v37 = vsel %vm136_vm1, %v1964_v30, %v542_v36  ;;  %v1802_v36 = vld [vmem:[%s2738_s6] ss:$0 sm:$0xff] }
 0x4d0   :  { %1988 = vmatmul.mubr.msk.f32.vlgmr.msra.gmra.mrb[4].mxu0 %vm48_vm0, %v546_v37 }
 0x4d1   :  { %2147 = vmatpush3.bf16.msra.mxu0 %v2144_v4  ;;  %v1811_v4 = vld [vmem:[%s2730_s2 + $0x38] sm:$0xff] }
 0x4d2   :  { %2149 = vmatprep.subr.bf16.mxu0 %v2148_v8  ;;  %v2164_v6 = vpack.c.bf16 %v1811_v4, %v1810_v3 }
 0x4d5   :  { %2151 = vmatpush3.bf16.msra.mxu0 %v2148_v8 }
 0x4d6   :  { %2153 = vmatprep.subr.bf16.mxu0 %v2152_v11 }
 0x4d9   :  { %2155 = vmatpush3.bf16.msra.mxu0 %v2152_v11 }
 0x4da   :  { %2157 = vmatprep.subr.bf16.mxu0 %v2156_v35 }
 0x4dd   :  { %2159 = vmatpush3.bf16.msra.mxu0 %v2156_v35 }
 0x5a3   :  { %v1989_v43 = vpop.f32.mrb[4].mxu0 }
 0x5a4   :  { %v633_v44 = vadd.f32 %v1989_v43, %v554_v42  ;;  %v627_v45 = vpop.f32.mrb[5].mxu0 }
 0x5a5   :  { %v628_v46 = vadd.f32 %v627_v45, %v554_v42 }
 0x5a6   :  { %v637_v47 = vadd.f32 %v633_v44, %v2394_v7 }
 0x5a7   :  { %v636_v48 = vadd.f32 %v628_v46, %v2387_v5  ;;  %v677_v5 = vld [vmem:[%s2736_s5] sm:$0xff]  ;;  %v781_v46 = vsub.s32 1, %v2475_v39 }
 0x5a8   :  { %v641_v49 = vsel %vm48_vm0, %v637_v47, 0.0  ;;  %v2136_v61 = vpack.c.bf16 %v678_v60, %v677_v5 }
 0x5a9   :  { %642 = vadd.xlane.f32.xlu1 %v641_v49  ;;  %v638_v50 = vsel %vm48_vm0, %v636_v48, 0.0 }
 0x5aa   :  { %639 = vadd.xlane.f32.xlu0 %v638_v50  ;;  %2137 = vmatprep.subr.bf16.mxu1 %v2136_v61 }
 0x5ab   :  { %2139 = vmatpush3.bf16.msra.mxu1 %v2136_v61 }
 0x5ac   :  { %2141 = vmatprep.subr.bf16.mxu1 %v2140_v0 }
 0x5af   :  { %2143 = vmatpush3.bf16.msra.mxu1 %v2140_v0  ;;  %v1808_v0 = vld [vmem:[%s2730_s2 + $0x20] sm:$0xff] }
 0x5b0   :  { %v2160_v2 = vpack.c.bf16 %v1809_v1, %v1808_v0 }
 0x5b2   :  { %2161 = vmatprep.subr.bf16.mxu1 %v2160_v2 }
 0x636   :  { %v643_v51 = vpop.xlane.xlu1 %642 }
 0x637   :  { %v646_v52 = vmul.f32 0.03125, %v643_v51  ;;  %v640_v53 = vpop.xlane.xlu0 %639 }
 0x638   :  { %v645_v54 = vmul.f32 0.03125, %v640_v53 }
 0x639   :  { %v648_v55 = vsub.f32 %v637_v47, %v646_v52  ;;  %v782_v47 = vrot.slane %v2481_v41, %v781_v46 }
 0x63a   :  { %v647_v56 = vsub.f32 %v636_v48, %v645_v54 }
 0x63b   :  { %v650_v59 = vmul.f32 %v648_v55, %v648_v55 }
 0x63c   :  { %v649_v57 = vmul.f32 %v647_v56, %v647_v56 }
 0x63d   :  { %v654_v7 = vsel %vm48_vm0, %v650_v59, 0.0 }
 0x63e   :  { %v651_v58 = vsel %vm48_vm0, %v649_v57, 0.0 }
 0x63f   :  { %652 = vadd.xlane.f32.xlu0 %v651_v58 }
 0x643   :  { %655 = vadd.xlane.f32.xlu0 %v654_v7 }
 0x6cc   :  { %v653_v12 = vpop.xlane.xlu0 %652 }
 0x6cd   :  { %v657_v14 = vmul.f32 0.03125, %v653_v12 }
 0x6cf   :  { %v659_v13 = vadd.f32 1e-05, %v657_v14 }
 0x6d0   :  { %v656_v15 = vpop.xlane.xlu0 %655 }
 0x6d1   :  { %2282 = vrsqrt.f32 %v659_v13  ;;  %v658_v16 = vmul.f32 0.03125, %v656_v15  ;;  %v895_v13 = vsub.s32 4, %v2475_v39  ;;  %v901_v15 = vsub.s32 5, %v2475_v39 }
 0x6d3   :  { %v660_v18 = vadd.f32 1e-05, %v658_v16  ;;  %v896_v16 = vrot.slane %v2481_v41, %v895_v13 }
 0x6d5   :  { %2284 = vrsqrt.f32 %v660_v18 }
 0x6db   :  { %v2283_v22 = vpop.eup %2282 }
 0x6dc   :  { %v663_v23 = vmul.f32 %v2283_v22, %v647_v56 }
 0x6de   :  { %v669_v25 = vmul.f32 %v668_v21, %v663_v23 }
 0x6df   :  { %v2285_v27 = vpop.eup %2284 }
 0x6e0   :  { %v664_v28 = vmul.f32 %v2285_v27, %v648_v55  ;;  %v675_v30 = vadd.f32 %v674_v24, %v669_v25 }
 0x6e2   :  { %v670_v31 = vmul.f32 %v668_v21, %v664_v28  ;;  %1998 = vmatprep.mubr.msk.f32.mxu1 %vm48_vm0, %v675_v30 }
 0x6e4   :  { %v676_v32 = vadd.f32 %v674_v24, %v670_v31  ;;  %v902_v24 = vrot.slane %v2481_v41, %v901_v15  ;;  %v1813_v31 = vld [vmem:[%s2732_s3 + $0x1] ss:$0 sm:$0xff] }
 0x6e6   :  { %1999 = vmatmul.mubr.msk.f32.vlgmr.msra.gmra.mrb[6].mxu1 %vm48_vm0, %v676_v32 }
 0x6e7   :  { %2163 = vmatpush3.bf16.msra.mxu1 %v2160_v2 }
 0x6e8   :  { %2165 = vmatprep.subr.bf16.mxu1 %v2164_v6 }
 0x6eb   :  { %2167 = vmatpush3.bf16.msra.mxu1 %v2164_v6 }
 0x7b9   :  { %v2000_v37 = vpop.f32.mrb[6].mxu1 }
 0x7ba   :  { %v766_v38 = vadd.f32 %v2000_v37, %v1802_v36  ;;  %v760_v42 = vpop.f32.mrb[7].mxu1 }
 0x7bb   :  { %v761_v43 = vadd.f32 %v1802_v36, %v760_v42 }
 0x7bc   :  { %v770_v45 = vmax.f32 %v766_v38, 0.0 }
 0x7bd   :  { %v769_v44 = vmax.f32 %v761_v43, 0.0 }
 0x7bf   :  { %2017 = vmatprep.mubr.msk.f32.mxu0 %vm783_vm3, %v769_v44 }
 0x7c0   :  { %2018 = vmatmul.mubr.msk.f32.vlgmr.msra.gmra.mrb[6].mxu0 %vm783_vm3, %v770_v45 }
 0x893   :  { %v2019_v48 = vpop.f32.mrb[6].mxu0 }
 0x894   :  { %v862_v49 = vadd.f32 %v2019_v48, %v782_v47  ;;  %v856_v50 = vpop.f32.mrb[7].mxu0 }
 0x895   :  { %v857_v51 = vadd.f32 %v856_v50, %v782_v47 }
 0x896   :  { %v866_v52 = vadd.f32 %v862_v49, %v676_v32 }
 0x897   :  { %v865_v53 = vadd.f32 %v857_v51, %v675_v30 }
 0x898   :  { %v870_v54 = vsel %vm48_vm0, %v866_v52, 0.0 }
 0x899   :  { %871 = vadd.xlane.f32.xlu0 %v870_v54  ;;  %v867_v55 = vsel %vm48_vm0, %v865_v53, 0.0 }
 0x89a   :  { %868 = vadd.xlane.f32.xlu1 %v867_v55 }
 0x926   :  { %v872_v56 = vpop.xlane.xlu0 %871 }
 0x927   :  { %v874_v57 = vmul.f32 0.03125, %v872_v56  ;;  %v869_v58 = vpop.xlane.xlu1 %868 }
 0x928   :  { %v873_v59 = vmul.f32 0.03125, %v869_v58 }
 0x929   :  { %v876_v7 = vsub.f32 %v866_v52, %v874_v57 }
 0x92a   :  { %v875_v5 = vsub.f32 %v865_v53, %v873_v59 }
 0x92b   :  { %v878_v60 = vmul.f32 %v876_v7, %v876_v7 }
 0x92c   :  { %v877_v61 = vmul.f32 %v875_v5, %v875_v5 }
 0x92d   :  { %v882_v62 = vsel %vm48_vm0, %v878_v60, 0.0 }
 0x92e   :  { %883 = vadd.xlane.f32.xlu0 %v882_v62  ;;  %v879_v63 = vsel %vm48_vm0, %v877_v61, 0.0 }
 0x92f   :  { %880 = vadd.xlane.f32.xlu1 %v879_v63 }
 0x9bb   :  { %v884_v8 = vpop.xlane.xlu0 %883 }
 0x9bc   :  { %v886_v9 = vmul.f32 0.03125, %v884_v8  ;;  %v881_v10 = vpop.xlane.xlu1 %880 }
 0x9bd   :  { %v885_v11 = vmul.f32 0.03125, %v881_v10 }
 0x9be   :  { %v888_v12 = vadd.f32 1e-05, %v886_v9 }
 0x9bf   :  { %v887_v14 = vadd.f32 1e-05, %v885_v11 }
 0x9c0   :  { %2286 = vrsqrt.f32 %v888_v12 }
 0x9c1   :  { %2288 = vrsqrt.f32 %v887_v14 }
 0x9ca   :  { %v2287_v18 = vpop.eup %2286 }
 0x9cb   :  { %v2289_v21 = vpop.eup %2288  ;;  %v892_v22 = vmul.f32 %v2287_v18, %v876_v7 }
 0x9cc   :  { %v891_v23 = vmul.f32 %v2289_v21, %v875_v5 }
 0x9cd   :  { %v898_v25 = vmul.f32 %v896_v16, %v892_v22 }
 0x9ce   :  { %v897_v27 = vmul.f32 %v896_v16, %v891_v23 }
 0x9cf   :  { %v2573_v30 = vadd.f32 %v902_v24, %v898_v25 }
 0x9d0   :  { %v2571_v28 = vadd.f32 %v902_v24, %v897_v27 }
 0x9d2   :  { %2028 = vmatprep.mubr.msk.f32.mxu1 %vm48_vm0, %v2571_v28 }
 0x9d3   :  { %2029 = vmatmul.mubr.msk.f32.vlgmr.msra.gmra.mrb[8].mxu1 %vm48_vm0, %v2573_v30 }
 0xaa6   :  { %v2030_v32 = vpop.f32.mrb[8].mxu1 }
 0xaa7   :  { %v998_v33 = vadd.f32 %v2030_v32, %v1813_v31  ;;  %v992_v34 = vpop.f32.mrb[9].mxu1 }
 0xaa8   :  { %v993_v41 = vadd.f32 %v1813_v31, %v992_v34 }
 0xaaa   :  { %2035 = vmatprep.mubr.msk.f32.mxu1 %vm136_vm1, %v993_v41  ;;  %v2583_v35 = vpack.i.bf16 %v998_v33, %v993_v41 }
 0xaac   :  { %2252 = vrot.lane.b32.xlu0 %v2583_v35, %s2318_s25  ;;  %2247 = vrot.lane.b32.xlu1 %v2583_v35, %s2317_s24 }
 0xab0   :  { %1203 = vrot.lane.b32.xlu1 %v993_v41, %s2316_s23 }
 0xab4   :  { %1205 = vrot.lane.b32.xlu1 %v998_v33, %s2316_s23 }
 0xb1e   :  { %v2253_v36 = vpop.permute.xlu0 %2252  ;;  %v2248_v37 = vpop.permute.xlu1 %2247 }
 0xb1f   :  { %v2255_v38 = vunpack.i.h.bf16 %v2253_v36  ;;  %v2254_v42 = vunpack.i.l.bf16 %v2253_v36  ;;  %v2250_v43 = vunpack.i.h.bf16 %v2248_v37  ;;  %v2249_v44 = vunpack.i.l.bf16 %v2248_v37 }
 0xb21   :  { %v2168_v45 = vpack.c.bf16 %v2250_v43, %v2249_v44  ;;  %v2178_v47 = vpack.c.bf16 %v2255_v38, %v2254_v42 }
 0xb22   :  { %v1204_v48 = vpop.permute.xlu1 %1203 }
 0xb23   :  { %2170 = vmatprep.subr.msk.bf16.mxu1 %vm2412_vm2, %v2168_v45 }
 0xb24   :  { %2173 = vmatpush3.bf16.xpose.msk.msra.mxu1 %vm2412_vm2, %v2168_v45 }
 0xb25   :  { %2180 = vmatprep.subr.msk.bf16.mxu1 %vm2412_vm2, %v2178_v47 }
 0xb26   :  { %v1206_v49 = vpop.permute.xlu1 %1205 }
 0xb2b   :  { %2036 = vmatmul.mubr.msk.f32.vlgmr.msra.gmra.mrb[10].mxu1 %vm136_vm1, %v998_v33 }
 0xb2c   :  { %2183 = vmatpush3.bf16.xpose.msk.msra.mxu1 %vm2412_vm2, %v2178_v47  ;;  %2049 = vmatprep.mubr.msk.f32.mxu1 %vm136_vm1, %v1204_v48 }
 0xb33   :  { %2050 = vmatmul.mubr.msk.f32.vlgmr.msra.gmra.mrb[12].mxu1 %vm136_vm1, %v1206_v49 }
 0xbfe   :  { %v2037_v50 = vpop.f32.mrb[10].mxu1 }
 0xbff   :  { %v1091_v51 = vmul.f32 0.25, %v2037_v50  ;;  %v1081_v52 = vpop.f32.mrb[11].mxu1 }
 0xc00   :  { %v1090_v53 = vmul.f32 0.25, %v1081_v52  ;;  %v1829_v52 = vld [vmem:[%s2734_s4 + $0x28] sm:$0xff] }
 0xc01   :  { %v1093_v54 = vadd.f32 %v1091_v51, %v2430_v26  ;;  %v1828_v51 = vld [vmem:[%s2734_s4 + $0x20] sm:$0xff] }
 0xc02   :  { %v1092_v55 = vadd.f32 %v1090_v53, %v2435_v29  ;;  %v2188_v53 = vpack.c.bf16 %v1829_v52, %v1828_v51 }
 0xc03   :  { %v1097_v56 = vsel %vm136_vm1, %v1093_v54, -inf }
 0xc04   :  { %1098 = vmax.xlane.f32.xlu1 %v1097_v56  ;;  %v1094_v57 = vsel %vm136_vm1, %v1092_v55, -inf }
 0xc05   :  { %1095 = vmax.xlane.f32.xlu0 %v1094_v57 }
 0xc06   :  { %v2051_v17 = vpop.f32.mrb[12].mxu1 }
 0xc07   :  { %v1285_v58 = vpop.f32.mrb[13].mxu1  ;;  %v1295_v59 = vmul.f32 0.25, %v2051_v17 }
 0xc08   :  { %v1294_v7 = vmul.f32 0.25, %v1285_v58 }
 0xc09   :  { %v1297_v61 = vadd.f32 %v1295_v59, %v2430_v26 }
 0xc0a   :  { %v1296_v5 = vadd.f32 %v1294_v7, %v2435_v29 }
 0xc0b   :  { %v1301_v62 = vsel %vm136_vm1, %v1297_v61, -inf }
 0xc0c   :  { %v1298_v60 = vsel %vm136_vm1, %v1296_v5, -inf }
 0xc0d   :  { %1299 = vmax.xlane.f32.xlu0 %v1298_v60 }
 0xc11   :  { %1302 = vmax.xlane.f32.xlu0 %v1301_v62  ;;  %v2643_v62 = vld [vmem:[%s2735_s8 + $0x8] sm:$0x3f] }
 0xc12   :  { %v1544_v51 = vrot.slane %v2643_v62, %v673_v20  ;;  %v1839_v20 = vld [vmem:[%s2738_s6 + $0x1] ss:$0 sm:$0xff] }
 0xc91   :  { %v1099_v63 = vpop.xlane.xlu1 %1098 }
 0xc92   :  { %v1101_v0 = vsub.f32 %v1093_v54, %v1099_v63  ;;  %v1096_v1 = vpop.xlane.xlu0 %1095  ;;  %v1830_v54 = vld [vmem:[%s2734_s4 + $0x30] sm:$0xff]  ;;  %v1425_v63 = vrot.slane %v2643_v62, %v553_v40 }
 0xc93   :  { %v1100_v2 = vsub.f32 %v1092_v55, %v1096_v1  ;;  %v1831_v55 = vld [vmem:[%s2734_s4 + $0x38] sm:$0xff] }
 0xc94   :  { %v1104_v3 = vmul.f32 1.442695, %v1101_v0  ;;  %v2192_v56 = vpack.c.bf16 %v1831_v55, %v1830_v54 }
 0xc95   :  { %v1102_v4 = vmul.f32 1.442695, %v1100_v2 }
 0xc96   :  { %2290 = vpow2.f32 %v1104_v3 }
 0xc97   :  { %2292 = vpow2.f32 %v1102_v4 }
 0xc9a   :  { %v1300_v6 = vpop.xlane.xlu0 %1299 }
 0xc9b   :  { %v1304_v8 = vsub.f32 %v1296_v5, %v1300_v6 }
 0xc9d   :  { %v1306_v9 = vmul.f32 1.442695, %v1304_v8 }
 0xc9e   :  { %v1303_v29 = vpop.xlane.xlu0 %1302 }
 0xc9f   :  { %2294 = vpow2.f32 %v1306_v9  ;;  %v1305_v10 = vsub.f32 %v1297_v61, %v1303_v29 }
 0xca0   :  { %v2291_v11 = vpop.eup %2290 }
 0xca1   :  { %v2293_v26 = vpop.eup %2292  ;;  %v1308_v12 = vmul.f32 1.442695, %v1305_v10  ;;  %v1109_v14 = vsel %vm136_vm1, %v2291_v11, 0.0 }
 0xca2   :  { %1110 = vadd.xlane.f32.xlu0 %v1109_v14  ;;  %v1106_v16 = vsel %vm136_vm1, %v2293_v26, 0.0 }
 0xca3   :  { %2296 = vpow2.f32 %v1308_v12  ;;  %1107 = vadd.xlane.f32.xlu1 %v1106_v16 }
 0xca9   :  { %v2295_v18 = vpop.eup %2294 }
 0xcaa   :  { %v1310_v21 = vsel %vm136_vm1, %v2295_v18, 0.0 }
 0xcab   :  { %1311 = vadd.xlane.f32.xlu1 %v1310_v21  ;;  %v1835_v21 = vld [vmem:[%s2736_s5 + $0x28] sm:$0xff] }
 0xcad   :  { %v2297_v22 = vpop.eup %2296 }
 0xcae   :  { %v1313_v23 = vsel %vm136_vm1, %v2297_v22, 0.0 }
 0xcaf   :  { %1314 = vadd.xlane.f32.xlu0 %v1313_v23  ;;  %v1836_v23 = vld [vmem:[%s2736_s5 + $0x30] sm:$0xff] }
 0xcbc   :  { %2257 = vrot.lane.b32.xlu1 %v2583_v35, %s2319_s1 }
 0xcc5   :  { %2262 = vrot.lane.b32.xlu0 %v2583_v35, %s2320_s30 }
 0xd2f   :  { %v1111_v25 = vpop.xlane.xlu0 %1110 }
 0xd30   :  { %v1108_v24 = vpop.xlane.xlu1 %1107 }
 0xd31   :  { %2298 = vrcp.f32 %v1108_v24  ;;  %v1837_v24 = vld [vmem:[%s2736_s5 + $0x38] sm:$0xff] }
 0xd32   :  { %2300 = vrcp.f32 %v1111_v25  ;;  %v2200_v25 = vpack.c.bf16 %v1837_v24, %v1836_v23 }
 0xd38   :  { %v1312_v27 = vpop.xlane.xlu1 %1311 }
 0xd39   :  { %2302 = vrcp.f32 %v1312_v27  ;;  %v1842_v27 = vld [vmem:[%s2737_s7 + $0x40] sm:$0xff] }
 0xd3b   :  { %v2299_v31 = vpop.eup %2298 }
 0xd3c   :  { %v2258_v32 = vpop.permute.xlu1 %2257  ;;  %v1315_v33 = vpop.xlane.xlu0 %1314  ;;  %v1114_v34 = vmul.f32 %v2299_v31, %v2293_v26  ;;  %v1843_v31 = vld [vmem:[%s2737_s7 + $0x48] sm:$0xff] }
 0xd3d   :  { %v2260_v41 = vunpack.i.h.bf16 %v2258_v32  ;;  %v2259_v36 = vunpack.i.l.bf16 %v2258_v32  ;;  %2304 = vrcp.f32 %v1315_v33  ;;  %v2301_v38 = vpop.eup %2300  ;;  %v1844_v32 = vld [vmem:[%s2737_s7 + $0x50] sm:$0xff]  ;;  %v2204_v33 = vpack.c.bf16 %v1843_v31, %v1842_v27 }
 0xd3e   :  { %2042 = vmatprep.mubr.msk.f32.mxu0 %vm136_vm1, %v1114_v34  ;;  %v1115_v45 = vmul.f32 %v2301_v38, %v2291_v11  ;;  %v1845_v34 = vld [vmem:[%s2737_s7 + $0x58] sm:$0xff]  ;;  %v1768_v27 = vrot.slane %v2643_v62, %v895_v13  ;;  %v2315_v13 = vld [vmem:[%s2731_s0] sm:$0xff] }
 0xd3f   :  { %v2174_v37 = vpack.c.bf16 %v2260_v41, %v2259_v36  ;;  %v2208_v41 = vpack.c.bf16 %v1845_v34, %v1844_v32  ;;  %v1846_v36 = vld [vmem:[%s2737_s7 + $0x60] sm:$0xff] }
 0xd40   :  { %v2263_v42 = vpop.permute.xlu0 %2262 }
 0xd41   :  { %v2265_v43 = vunpack.i.h.bf16 %v2263_v42  ;;  %v2264_v35 = vunpack.i.l.bf16 %v2263_v42  ;;  %2175 = vmatprep.subr.bf16.mxu0 %v2174_v37 }
 0xd42   :  { %2177 = vmatpush3.bf16.msra.mxu0 %v2174_v37  ;;  %v1847_v37 = vld [vmem:[%s2737_s7 + $0x68] sm:$0xff] }
 0xd43   :  { %v2303_v44 = vpop.eup %2302  ;;  %v2184_v47 = vpack.c.bf16 %v2265_v43, %v2264_v35  ;;  %v2212_v38 = vpack.c.bf16 %v1847_v37, %v1846_v36 }
 0xd44   :  { %v1318_v48 = vmul.f32 %v2303_v44, %v2295_v18 }
 0xd45   :  { %2043 = vmatmul.mubr.msk.f32.vlgmr.msra.gmra.mrb[8].mxu0 %vm136_vm1, %v1115_v45  ;;  %2185 = vmatprep.subr.bf16.mxu0 %v2184_v47 }
 0xd46   :  { %2187 = vmatpush3.bf16.msra.mxu0 %v2184_v47  ;;  %2056 = vmatprep.mubr.msk.f32.mxu0 %vm136_vm1, %v1318_v48  ;;  %v1538_v48 = vrot.slane %v2643_v62, %v667_v19  ;;  %v1848_v19 = vld [vmem:[%s2737_s7 + $0x70] sm:$0xff] }
 0xd47   :  { %v2305_v49 = vpop.eup %2304  ;;  %2189 = vmatprep.subr.bf16.mxu0 %v2188_v53 }
 0xd48   :  { %v1319_v50 = vmul.f32 %v2305_v49, %v2297_v22 }
 0xd4a   :  { %2057 = vmatmul.mubr.msk.f32.vlgmr.msra.gmra.mrb[10].mxu0 %vm136_vm1, %v1319_v50 }
 0xd4b   :  { %2191 = vmatpush3.bf16.msra.mxu0 %v2188_v53 }
 0xd4c   :  { %2193 = vmatprep.subr.bf16.mxu0 %v2192_v56 }
 0xd4f   :  { %2195 = vmatpush3.bf16.msra.mxu0 %v2192_v56 }
 0xd50   :  { %2205 = vmatprep.subr.bf16.mxu0 %v2204_v33 }
 0xe18   :  { %v2044_v57 = vpop.f32.mrb[8].mxu0 }
 0xe19   :  { %v1194_v17 = vpop.f32.mrb[9].mxu0 }
 0xe1d   :  { %v2058_v58 = vpop.f32.mrb[10].mxu0 }
 0xe1e   :  { %v1398_v59 = vpop.f32.mrb[11].mxu0 }
 0xe1f   :  { %1409 = vrot.lane.b32.xlu1 %v1398_v59, %s2321_s18 }
 0xe23   :  { %1411 = vrot.lane.b32.xlu1 %v2058_v58, %s2321_s18 }
 0xe91   :  { %v1410_v7 = vpop.permute.xlu1 %1409 }
 0xe92   :  { %v1415_v5 = vsel %vm136_vm1, %v1194_v17, %v1410_v7  ;;  %v1849_v17 = vld [vmem:[%s2737_s7 + $0x78] sm:$0xff] }
 0xe93   :  { %2067 = vmatprep.mubr.msk.f32.mxu0 %vm48_vm0, %v1415_v5  ;;  %v2216_v58 = vpack.c.bf16 %v1849_v17, %v1848_v19 }
 0xe95   :  { %v1412_v60 = vpop.permute.xlu1 %1411 }
 0xe96   :  { %v1416_v61 = vsel %vm136_vm1, %v2044_v57, %v1412_v60 }
 0xe97   :  { %2068 = vmatmul.mubr.msk.f32.vlgmr.msra.gmra.mrb[12].mxu0 %vm48_vm0, %v1416_v61 }
 0xe98   :  { %2207 = vmatpush3.bf16.msra.mxu0 %v2204_v33  ;;  %v1774_v33 = vrot.slane %v2643_v62, %v901_v15 }
 0xe99   :  { %2209 = vmatprep.subr.bf16.mxu0 %v2208_v41 }
 0xe9c   :  { %2211 = vmatpush3.bf16.msra.mxu0 %v2208_v41 }
 0xe9d   :  { %2213 = vmatprep.subr.bf16.mxu0 %v2212_v38 }
 0xea0   :  { %2215 = vmatpush3.bf16.msra.mxu0 %v2212_v38 }
 0xea1   :  { %2217 = vmatprep.subr.bf16.mxu0 %v2216_v58 }
 0xea4   :  { %2219 = vmatpush3.bf16.msra.mxu0 %v2216_v58 }
 0xf6a   :  { %v2069_v0 = vpop.f32.mrb[12].mxu0 }
 0xf6b   :  { %v1504_v1 = vadd.f32 %v2069_v0, %v1425_v63  ;;  %v1498_v2 = vpop.f32.mrb[13].mxu0  ;;  %v1655_v0 = vrot.slane %v2643_v62, %v781_v46 }
 0xf6c   :  { %v1499_v3 = vadd.f32 %v1498_v2, %v1425_v63 }
 0xf6d   :  { %v1508_v4 = vadd.f32 %v1504_v1, %v2573_v30 }
 0xf6e   :  { %v1507_v6 = vadd.f32 %v1499_v3, %v2571_v28  ;;  %v1834_v28 = vld [vmem:[%s2736_s5 + $0x20] sm:$0xff] }
 0xf6f   :  { %v1512_v8 = vsel %vm48_vm0, %v1508_v4, 0.0  ;;  %v2196_v22 = vpack.c.bf16 %v1835_v21, %v1834_v28 }
 0xf70   :  { %1513 = vadd.xlane.f32.xlu1 %v1512_v8  ;;  %v1509_v9 = vsel %vm48_vm0, %v1507_v6, 0.0 }
 0xf71   :  { %1510 = vadd.xlane.f32.xlu0 %v1509_v9  ;;  %2197 = vmatprep.subr.bf16.mxu1 %v2196_v22 }
 0xf72   :  { %2199 = vmatpush3.bf16.msra.mxu1 %v2196_v22 }
 0xf73   :  { %2201 = vmatprep.subr.bf16.mxu1 %v2200_v25 }
 0xf76   :  { %2203 = vmatpush3.bf16.msra.mxu1 %v2200_v25 }
 0xffd   :  { %v1514_v29 = vpop.xlane.xlu1 %1513 }
 0xffe   :  { %v1516_v10 = vmul.f32 0.03125, %v1514_v29  ;;  %v1511_v11 = vpop.xlane.xlu0 %1510 }
 0xfff   :  { %v1515_v26 = vmul.f32 0.03125, %v1511_v11 }
0x1000   :  { %v1518_v12 = vsub.f32 %v1508_v4, %v1516_v10 }
0x1001   :  { %v1517_v40 = vsub.f32 %v1507_v6, %v1515_v26 }
0x1002   :  { %v1520_v18 = vmul.f32 %v1518_v12, %v1518_v12 }
0x1003   :  { %v1519_v14 = vmul.f32 %v1517_v40, %v1517_v40 }
0x1004   :  { %v1524_v30 = vsel %vm48_vm0, %v1520_v18, 0.0 }
0x1005   :  { %v1521_v16 = vsel %vm48_vm0, %v1519_v14, 0.0 }
0x1006   :  { %1522 = vadd.xlane.f32.xlu0 %v1521_v16 }
0x100a   :  { %1525 = vadd.xlane.f32.xlu0 %v1524_v30 }
0x1093   :  { %v1523_v42 = vpop.xlane.xlu0 %1522 }
0x1094   :  { %v1527_v43 = vmul.f32 0.03125, %v1523_v42 }
0x1096   :  { %v1529_v35 = vadd.f32 1e-05, %v1527_v43  ;;  %v2314_v43 = vld [vmem:[%s2731_s0 + $0x8] sm:$0xff] }
0x1097   :  { %v1526_v44 = vpop.xlane.xlu0 %1525 }
0x1098   :  { %2306 = vrsqrt.f32 %v1529_v35  ;;  %v1528_v45 = vmul.f32 0.03125, %v1526_v44 }
0x109a   :  { %v1530_v47 = vadd.f32 1e-05, %v1528_v45 }
0x109c   :  { %2308 = vrsqrt.f32 %v1530_v47 }
0x10a2   :  { %v2307_v49 = vpop.eup %2306 }
0x10a3   :  { %v1533_v50 = vmul.f32 %v2307_v49, %v1517_v40 }
0x10a5   :  { %v1539_v52 = vmul.f32 %v1538_v48, %v1533_v50 }
0x10a6   :  { %v2309_v53 = vpop.eup %2308 }
0x10a7   :  { %v1534_v54 = vmul.f32 %v2309_v53, %v1518_v12  ;;  %v1545_v55 = vadd.f32 %v1544_v51, %v1539_v52 }
0x10a9   :  { %v1540_v56 = vmul.f32 %v1538_v48, %v1534_v54  ;;  %2078 = vmatprep.mubr.msk.f32.mxu1 %vm48_vm0, %v1545_v55 }
0x10ab   :  { %v1546_v57 = vadd.f32 %v1544_v51, %v1540_v56 }
0x10ad   :  { %2079 = vmatmul.mubr.msk.f32.vlgmr.msra.gmra.mrb[14].mxu1 %vm48_vm0, %v1546_v57 }
0x1180   :  { %v2080_v59 = vpop.f32.mrb[14].mxu1 }
0x1181   :  { %v1638_v7 = vadd.f32 %v2080_v59, %v1839_v20  ;;  %v1632_v5 = vpop.f32.mrb[15].mxu1 }
0x1182   :  { %v1633_v60 = vadd.f32 %v1839_v20, %v1632_v5 }
0x1183   :  { %v1642_v63 = vmax.f32 %v1638_v7, 0.0 }
0x1184   :  { %v1641_v61 = vmax.f32 %v1633_v60, 0.0 }
0x1186   :  { %2097 = vmatprep.mubr.msk.f32.mxu0 %vm783_vm3, %v1641_v61 }
0x1187   :  { %2098 = vmatmul.mubr.msk.f32.vlgmr.msra.gmra.mrb[14].mxu0 %vm783_vm3, %v1642_v63 }
0x125a   :  { %v2099_v1 = vpop.f32.mrb[14].mxu0 }
0x125b   :  { %v1734_v2 = vadd.f32 %v2099_v1, %v1655_v0  ;;  %v1728_v3 = vpop.f32.mrb[15].mxu0 }
0x125c   :  { %v1729_v4 = vadd.f32 %v1728_v3, %v1655_v0 }
0x125d   :  { %v1738_v6 = vadd.f32 %v1734_v2, %v1546_v57 }
0x125e   :  { %v1737_v8 = vadd.f32 %v1729_v4, %v1545_v55 }
0x125f   :  { %v1742_v9 = vsel %vm48_vm0, %v1738_v6, 0.0 }
0x1260   :  { %1743 = vadd.xlane.f32.xlu0 %v1742_v9  ;;  %v1739_v29 = vsel %vm48_vm0, %v1737_v8, 0.0 }
0x1261   :  { %1740 = vadd.xlane.f32.xlu1 %v1739_v29 }
0x12ed   :  { %v1744_v10 = vpop.xlane.xlu0 %1743 }
0x12ee   :  { %v1746_v11 = vmul.f32 0.03125, %v1744_v10  ;;  %v1741_v26 = vpop.xlane.xlu1 %1740 }
0x12ef   :  { %v1745_v12 = vmul.f32 0.03125, %v1741_v26 }
0x12f0   :  { %v1748_v40 = vsub.f32 %v1738_v6, %v1746_v11 }
0x12f1   :  { %v1747_v14 = vsub.f32 %v1737_v8, %v1745_v12 }
0x12f2   :  { %v1750_v16 = vmul.f32 %v1748_v40, %v1748_v40 }
0x12f3   :  { %v1749_v46 = vmul.f32 %v1747_v14, %v1747_v14 }
0x12f4   :  { %v1754_v18 = vsel %vm48_vm0, %v1750_v16, 0.0 }
0x12f5   :  { %1755 = vadd.xlane.f32.xlu0 %v1754_v18  ;;  %v1751_v30 = vsel %vm48_vm0, %v1749_v46, 0.0 }
0x12f6   :  { %1752 = vadd.xlane.f32.xlu1 %v1751_v30 }
0x1382   :  { %v1756_v28 = vpop.xlane.xlu0 %1755 }
0x1383   :  { %v1758_v21 = vmul.f32 0.03125, %v1756_v28  ;;  %v1753_v22 = vpop.xlane.xlu1 %1752 }
0x1384   :  { %v1757_v23 = vmul.f32 0.03125, %v1753_v22 }
0x1385   :  { %v1760_v24 = vadd.f32 1e-05, %v1758_v21 }
0x1386   :  { %v1759_v25 = vadd.f32 1e-05, %v1757_v23 }
0x1387   :  { %2310 = vrsqrt.f32 %v1760_v24 }
0x1388   :  { %2312 = vrsqrt.f32 %v1759_v25 }
0x1391   :  { %v2311_v31 = vpop.eup %2310 }
0x1392   :  { %v2313_v32 = vpop.eup %2312  ;;  %v1764_v34 = vmul.f32 %v2311_v31, %v1748_v40 }
0x1393   :  { %v1763_v41 = vmul.f32 %v2313_v32, %v1747_v14 }
0x1394   :  { %v1770_v36 = vmul.f32 %v1768_v27, %v1764_v34 }
0x1395   :  { %v1769_v37 = vmul.f32 %v1768_v27, %v1763_v41 }
0x1396   :  { %v1776_v38 = vadd.f32 %v1774_v33, %v1770_v36 }
0x1397   :  { %v1775_v42 = vadd.f32 %v1774_v33, %v1769_v37 }
0x1398   :  { %v1778_v35 = vadd.f32 %v2314_v43, %v1776_v38 }
0x1399   :  { %v1777_v44 = vadd.f32 %v2315_v13, %v1775_v42 }
0x139a   :  { %1780 = vst.msk [vmem:[%s2739_s9 + $0x8] sm:$0xff] %vm48_vm0, %v1778_v35 }
0x139b   :  { %1779 = vst.msk [vmem:[%s2739_s9] sm:$0xff] %vm48_vm0, %v1777_v44 }

</bundles_post_ra>
